<compile_context>
chip_gen: v6e
topology: v6e:2x2x1
jax: 0.10.0
libtpu: 0.0.40
codegen_flags: <defaults>
</compile_context>

<pallas_src>
import jax
import jax.numpy as jnp
from jax.experimental import pallas as pl
from jax.experimental.pallas import tpu as pltpu


# ----------------------------------------------------------------------------
# Fused conv (as one big matmul) + bias + ReLU + folded BatchNorm.
#   xt_ref : (1, HW, Kc)  bf16 im2col slab for one image
#   w_ref  : (Kc, Co)     bf16 reshaped conv weights (kh, kw, ci) x Co
#   aff_ref: (3, Co)      f32  [conv bias, bn scale, bn shift]
# ----------------------------------------------------------------------------
def conv_relu_bn_kernel(xt_ref, w_ref, aff_ref, out_ref):
    acc = jnp.dot(xt_ref[0], w_ref[...], preferred_element_type=jnp.float32)
    aff = aff_ref[...]
    z = acc + aff[0:1, :]                      # conv bias (pre-ReLU)
    z = jnp.maximum(z, 0.0)                    # ReLU
    z = z * aff[1:2, :] + aff[2:3, :]          # BatchNorm (eval, folded)
    out_ref[0] = z.astype(out_ref.dtype)


def conv_relu_bn(xt, w, aff, hw_shape):
    N, HW, Kc = xt.shape
    Co = w.shape[1]
    y = pl.pallas_call(
        conv_relu_bn_kernel,
        out_shape=jax.ShapeDtypeStruct((N, HW, Co), jnp.float32),
        grid=(N,),
        in_specs=[
            pl.BlockSpec((1, HW, Kc), lambda n: (n, 0, 0)),
            pl.BlockSpec((Kc, Co), lambda n: (0, 0)),
            pl.BlockSpec((3, Co), lambda n: (0, 0)),
        ],
        out_specs=pl.BlockSpec((1, HW, Co), lambda n: (n, 0, 0)),
        compiler_params=pltpu.CompilerParams(dimension_semantics=("parallel",)),
    )(xt, w, aff)
    H, W = hw_shape
    return y.reshape(N, H, W, Co)


# ----------------------------------------------------------------------------
# fc1 (reduction-tiled, f32 accumulator) + ReLU + fc2 + softmax, one kernel.
# ----------------------------------------------------------------------------
def mlp_softmax_kernel(x_ref, w1_ref, b1_ref, w2_ref, b2_ref, out_ref, acc_ref):
    k = pl.program_id(0)

    @pl.when(k == 0)
    def _():
        acc_ref[...] = jnp.zeros_like(acc_ref)

    acc_ref[...] += jnp.dot(x_ref[...], w1_ref[...],
                            preferred_element_type=jnp.float32)

    @pl.when(k == pl.num_programs(0) - 1)
    def _():
        h = jnp.maximum(acc_ref[...] + b1_ref[...], 0.0)
        logits = jnp.dot(h.astype(w2_ref.dtype), w2_ref[...],
                         preferred_element_type=jnp.float32) + b2_ref[...]
        m = jnp.max(logits, axis=-1, keepdims=True)
        e = jnp.exp(logits - m)
        out_ref[...] = (e / jnp.sum(e, axis=-1, keepdims=True)).astype(out_ref.dtype)


def mlp_softmax(x, w1, b1, w2, b2, *, tk=512):
    B, K = x.shape
    Hd = w1.shape[1]
    C = w2.shape[1]
    if K % tk != 0:
        tk = K
    nk = K // tk
    return pl.pallas_call(
        mlp_softmax_kernel,
        out_shape=jax.ShapeDtypeStruct((B, C), jnp.float32),
        grid=(nk,),
        in_specs=[
            pl.BlockSpec((B, tk), lambda k: (0, k)),
            pl.BlockSpec((tk, Hd), lambda k: (k, 0)),
            pl.BlockSpec((1, Hd), lambda k: (0, 0)),
            pl.BlockSpec((Hd, C), lambda k: (0, 0)),
            pl.BlockSpec((1, C), lambda k: (0, 0)),
        ],
        out_specs=pl.BlockSpec((B, C), lambda k: (0, 0)),
        scratch_shapes=[pltpu.VMEM((B, Hd), jnp.float32)],
        compiler_params=pltpu.CompilerParams(dimension_semantics=("arbitrary",)),
    )(x, w1, b1, w2, b2)


# ----------------------------------------------------------------------------
# Glue (plain JAX, cheap at these sizes): im2col layout, 2x2 max-pool.
# ----------------------------------------------------------------------------
def im2col(x_nhwc, K, kc_pad):
    """Shifted-window layout: (N, H, W, Ci) -> (N, HW, K*K*Ci) in (kh, kw, ci) order."""
    N, H, W, Ci = x_nhwc.shape
    p = (K - 1) // 2
    xp = jnp.pad(x_nhwc, ((0, 0), (p, p), (p, p), (0, 0)))
    cols = [xp[:, kh:kh + H, kw:kw + W, :] for kh in range(K) for kw in range(K)]
    xt = jnp.concatenate(cols, axis=-1).reshape(N, H * W, K * K * Ci)
    if kc_pad > K * K * Ci:
        xt = jnp.pad(xt, ((0, 0), (0, 0), (0, kc_pad - K * K * Ci)))
    return xt.astype(jnp.bfloat16)


def max_pool2(x):  # NHWC, kernel 2, stride 2
    N, H, W, C = x.shape
    return jnp.max(x.reshape(N, H // 2, 2, W // 2, 2, C), axis=(2, 4))


def cnn_forward(x_nchw, p):
    x = jnp.transpose(x_nchw, (0, 2, 3, 1))                    # NCHW -> NHWC (Ci=1)
    N, H, W, _ = x.shape

    xt1 = im2col(x, 5, p["w_conv1"].shape[0])                  # (N, HW, 32)
    y = conv_relu_bn(xt1, p["w_conv1"], p["aff1"], (H, W))     # (N, H, W, 32)
    y = max_pool2(y)                                           # (N, H/2, W/2, 32)

    xt2 = im2col(y, 5, p["w_conv2"].shape[0])                  # (N, HW/4, 800)
    y = conv_relu_bn(xt2, p["w_conv2"], p["aff2"], (H // 2, W // 2))
    y = max_pool2(y)                                           # (N, H/4, W/4, 64)

    # flatten in PyTorch x.view(-1, C*H*W) order (NCHW)
    feats = jnp.transpose(y, (0, 3, 1, 2)).reshape(y.shape[0], -1)
    return mlp_softmax(feats.astype(jnp.bfloat16),
                       p["w_fc1"], p["b_fc1"], p["w_fc2"], p["b_fc2"])


# ----------------------------------------------------------------------------
# Deterministic synthetic parameters (shapes follow the module; fc1 input dim
# adapted to the small spatial size used here).
# ----------------------------------------------------------------------------
def init_params(key, in_hw):
    H, W = in_hw
    ks = jax.random.split(key, 16)
    eps = 1e-5

    def rnd(k, shape, scale=0.05):
        return scale * jax.random.normal(k, shape, jnp.float32)

    def fold_bn(kg, kb, km, kv, c):
        gamma = 1.0 + rnd(kg, (1, c), 0.1)
        beta = rnd(kb, (1, c), 0.1)
        rmean = rnd(km, (1, c), 0.1)
        rvar = 0.5 + jnp.abs(rnd(kv, (1, c), 0.2))
        scale = gamma / jnp.sqrt(rvar + eps)
        shift = beta - rmean * scale
        return scale, shift

    def pad_kc(w2d, kc_pad):
        return jnp.pad(w2d, ((0, kc_pad - w2d.shape[0]), (0, 0)))

    # conv1: HWIO (5,5,1,32) -> (25,32), contraction zero-padded to 32
    w_conv1 = pad_kc(rnd(ks[0], (5, 5, 1, 32)).reshape(25, 32), 32).astype(jnp.bfloat16)
    b_conv1 = rnd(ks[1], (1, 32))
    s1, sh1 = fold_bn(ks[4], ks[5], ks[6], ks[7], 32)
    aff1 = jnp.concatenate([b_conv1, s1, sh1], axis=0)          # (3, 32)

    # conv2: HWIO (5,5,32,64) -> (800,64)
    w_conv2 = rnd(ks[2], (5, 5, 32, 64)).reshape(800, 64).astype(jnp.bfloat16)
    b_conv2 = rnd(ks[3], (1, 64))
    s2, sh2 = fold_bn(ks[8], ks[9], ks[10], ks[11], 64)
    aff2 = jnp.concatenate([b_conv2, s2, sh2], axis=0)          # (3, 64)

    feat = (H // 4) * (W // 4) * 64      # module uses 8*156*64 at its full input size
    w_fc1 = rnd(ks[12], (feat, 1024), 0.02).astype(jnp.bfloat16)  # stored transposed vs torch
    b_fc1 = rnd(ks[13], (1, 1024))
    w_fc2 = rnd(ks[14], (1024, 2), 0.02).astype(jnp.bfloat16)
    b_fc2 = rnd(ks[15], (1, 2))

    return dict(w_conv1=w_conv1, aff1=aff1, w_conv2=w_conv2, aff2=aff2,
                w_fc1=w_fc1, b_fc1=b_fc1, w_fc2=w_fc2, b_fc2=b_fc2)


if __name__ == "__main__":
    key = jax.random.PRNGKey(0)
    kx, kp = jax.random.split(key)
    N, H, W = 2, 16, 16
    x = jax.random.normal(kx, (N, 1, H, W), jnp.float32)   # NCHW, like PyTorch
    params = init_params(kp, (H, W))

    out = jax.jit(cnn_forward)(x, params)
    out = jax.block_until_ready(out)

    assert out.shape == (N, 2)
    assert bool(jnp.all(jnp.isfinite(out)))
    assert bool(jnp.allclose(jnp.sum(out, axis=1), 1.0, atol=1e-3))
    print("KERNEL_OK")
</pallas_src>

<mosaic_0001>
module attributes {stable_mosaic.version = 11 : i64} {
  func.func @conv_relu_bn_kernel(%arg0: i32, %arg1: memref<1x256x32xbf16, #tpu.memory_space<vmem>>, %arg2: memref<32x32xbf16, #tpu.memory_space<vmem>>, %arg3: memref<3x32xf32, #tpu.memory_space<vmem>>, %arg4: memref<1x256x32xf32, #tpu.memory_space<vmem>>) attributes {dimension_semantics = [#tpu.dimension_semantics<parallel>], iteration_bounds = array<i64: 2>, scalar_prefetch = 0 : i64, scratch_operands = 0 : i64, tpu.core_type = #tpu.core_type<tc>, window_params = [{transform_indices = @transform_0, window_bounds = array<i64: 1, 256, 32>}, {pipeline_mode = #tpu.pipeline_mode<synchronous>, transform_indices = @transform_1, window_bounds = array<i64: 32, 32>}, {pipeline_mode = #tpu.pipeline_mode<synchronous>, transform_indices = @transform_2, window_bounds = array<i64: 3, 32>}, {transform_indices = @transform_3, window_bounds = array<i64: 1, 256, 32>}]} {
    %c0 = arith.constant 0 : index
    %c0_0 = arith.constant 0 : index
    %c0_1 = arith.constant 0 : index
    %0 = vector.load %arg1[%c0, %c0_0, %c0_1] : memref<1x256x32xbf16, #tpu.memory_space<vmem>>, vector<1x256x32xbf16>
    %1 = vector.shape_cast %0 : vector<1x256x32xbf16> to vector<256x32xbf16>
    %c0_2 = arith.constant 0 : index
    %c0_3 = arith.constant 0 : index
    %2 = vector.load %arg2[%c0_2, %c0_3] : memref<32x32xbf16, #tpu.memory_space<vmem>>, vector<32x32xbf16>
    %cst = arith.constant dense<0.000000e+00> : vector<256x32xf32>
    %3 = tpu.matmul %1, %2, %cst {dimension_numbers = #tpu.dot_dimension_numbers<[1], [0], [0], [1], [0, 0, 1, 1], [], []>} : vector<256x32xbf16>, vector<32x32xbf16>, vector<256x32xf32> -> vector<256x32xf32>
    %c0_4 = arith.constant 0 : index
    %c0_5 = arith.constant 0 : index
    %4 = vector.load %arg3[%c0_4, %c0_5] : memref<3x32xf32, #tpu.memory_space<vmem>>, vector<3x32xf32>
    %5 = vector.extract_strided_slice %4 {offsets = [0, 0], sizes = [1, 32], strides = [1, 1]} : vector<3x32xf32> to vector<1x32xf32>
    %6 = vector.broadcast %5 : vector<1x32xf32> to vector<256x32xf32>
    %7 = arith.addf %3, %6 : vector<256x32xf32>
    %cst_6 = arith.constant 0.000000e+00 : f32
    %8 = vector.broadcast %cst_6 : f32 to vector<256x32xf32>
    %9 = arith.maximumf %7, %8 : vector<256x32xf32>
    %10 = vector.extract_strided_slice %4 {offsets = [1, 0], sizes = [1, 32], strides = [1, 1]} : vector<3x32xf32> to vector<1x32xf32>
    %11 = vector.broadcast %10 : vector<1x32xf32> to vector<256x32xf32>
    %12 = arith.mulf %9, %11 : vector<256x32xf32>
    %13 = vector.extract_strided_slice %4 {offsets = [2, 0], sizes = [1, 32], strides = [1, 1]} : vector<3x32xf32> to vector<1x32xf32>
    %14 = vector.broadcast %13 : vector<1x32xf32> to vector<256x32xf32>
    %15 = arith.addf %12, %14 : vector<256x32xf32>
    %c0_7 = arith.constant 0 : index
    %c0_8 = arith.constant 0 : index
    %c0_9 = arith.constant 0 : index
    %16 = vector.load %arg4[%c0_7, %c0_8, %c0_9] : memref<1x256x32xf32, #tpu.memory_space<vmem>>, vector<1x256x32xf32>
    %17 = vector.shape_cast %16 : vector<1x256x32xf32> to vector<256x32xf32>
    %18 = vector.shape_cast %15 : vector<256x32xf32> to vector<1x256x32xf32>
    tpu.vector_store %arg4[%c0_7, %c0_8, %c0_9], %18 {strides = array<i32>} : memref<1x256x32xf32, #tpu.memory_space<vmem>>, vector<1x256x32xf32>,
    return
  }
  func.func @transform_0(%arg0: i32) -> (i32, i32, i32) {
    %c0_i32 = arith.constant 0 : i32
    %c0_i32_0 = arith.constant 0 : i32
    %c0_i32_1 = arith.constant 0 : i32
    return %arg0, %c0_i32, %c0_i32_0 : i32, i32, i32
  }
  func.func @transform_1(%arg0: i32) -> (i32, i32) {
    %c0_i32 = arith.constant 0 : i32
    %c0_i32_0 = arith.constant 0 : i32
    %c0_i32_1 = arith.constant 0 : i32
    return %c0_i32, %c0_i32_0 : i32, i32
  }
  func.func @transform_2(%arg0: i32) -> (i32, i32) {
    %c0_i32 = arith.constant 0 : i32
    %c0_i32_0 = arith.constant 0 : i32
    %c0_i32_1 = arith.constant 0 : i32
    return %c0_i32, %c0_i32_0 : i32, i32
  }
  func.func @transform_3(%arg0: i32) -> (i32, i32, i32) {
    %c0_i32 = arith.constant 0 : i32
    %c0_i32_0 = arith.constant 0 : i32
    %c0_i32_1 = arith.constant 0 : i32
    return %arg0, %c0_i32, %c0_i32_0 : i32, i32, i32
  }
}

module attributes {stable_mosaic.version = 11 : i64} {
  func.func @conv_relu_bn_kernel(%arg0: i32, %arg1: memref<1x64x800xbf16, #tpu.memory_space<vmem>>, %arg2: memref<800x64xbf16, #tpu.memory_space<vmem>>, %arg3: memref<3x64xf32, #tpu.memory_space<vmem>>, %arg4: memref<1x64x64xf32, #tpu.memory_space<vmem>>) attributes {dimension_semantics = [#tpu.dimension_semantics<parallel>], iteration_bounds = array<i64: 2>, scalar_prefetch = 0 : i64, scratch_operands = 0 : i64, tpu.core_type = #tpu.core_type<tc>, window_params = [{transform_indices = @transform_0, window_bounds = array<i64: 1, 64, 800>}, {pipeline_mode = #tpu.pipeline_mode<synchronous>, transform_indices = @transform_1, window_bounds = array<i64: 800, 64>}, {pipeline_mode = #tpu.pipeline_mode<synchronous>, transform_indices = @transform_2, window_bounds = array<i64: 3, 64>}, {transform_indices = @transform_3, window_bounds = array<i64: 1, 64, 64>}]} {
    %c0 = arith.constant 0 : index
    %c0_0 = arith.constant 0 : index
    %c0_1 = arith.constant 0 : index
    %0 = vector.load %arg1[%c0, %c0_0, %c0_1] : memref<1x64x800xbf16, #tpu.memory_space<vmem>>, vector<1x64x800xbf16>
    %1 = vector.shape_cast %0 : vector<1x64x800xbf16> to vector<64x800xbf16>
    %c0_2 = arith.constant 0 : index
    %c0_3 = arith.constant 0 : index
    %2 = vector.load %arg2[%c0_2, %c0_3] : memref<800x64xbf16, #tpu.memory_space<vmem>>, vector<800x64xbf16>
    %cst = arith.constant dense<0.000000e+00> : vector<64x64xf32>
    %3 = tpu.matmul %1, %2, %cst {dimension_numbers = #tpu.dot_dimension_numbers<[1], [0], [0], [1], [0, 0, 1, 1], [], []>} : vector<64x800xbf16>, vector<800x64xbf16>, vector<64x64xf32> -> vector<64x64xf32>
    %c0_4 = arith.constant 0 : index
    %c0_5 = arith.constant 0 : index
    %4 = vector.load %arg3[%c0_4, %c0_5] : memref<3x64xf32, #tpu.memory_space<vmem>>, vector<3x64xf32>
    %5 = vector.extract_strided_slice %4 {offsets = [0, 0], sizes = [1, 64], strides = [1, 1]} : vector<3x64xf32> to vector<1x64xf32>
    %6 = vector.broadcast %5 : vector<1x64xf32> to vector<64x64xf32>
    %7 = arith.addf %3, %6 : vector<64x64xf32>
    %cst_6 = arith.constant 0.000000e+00 : f32
    %8 = vector.broadcast %cst_6 : f32 to vector<64x64xf32>
    %9 = arith.maximumf %7, %8 : vector<64x64xf32>
    %10 = vector.extract_strided_slice %4 {offsets = [1, 0], sizes = [1, 64], strides = [1, 1]} : vector<3x64xf32> to vector<1x64xf32>
    %11 = vector.broadcast %10 : vector<1x64xf32> to vector<64x64xf32>
    %12 = arith.mulf %9, %11 : vector<64x64xf32>
    %13 = vector.extract_strided_slice %4 {offsets = [2, 0], sizes = [1, 64], strides = [1, 1]} : vector<3x64xf32> to vector<1x64xf32>
    %14 = vector.broadcast %13 : vector<1x64xf32> to vector<64x64xf32>
    %15 = arith.addf %12, %14 : vector<64x64xf32>
    %c0_7 = arith.constant 0 : index
    %c0_8 = arith.constant 0 : index
    %c0_9 = arith.constant 0 : index
    %16 = vector.load %arg4[%c0_7, %c0_8, %c0_9] : memref<1x64x64xf32, #tpu.memory_space<vmem>>, vector<1x64x64xf32>
    %17 = vector.shape_cast %16 : vector<1x64x64xf32> to vector<64x64xf32>
    %18 = vector.shape_cast %15 : vector<64x64xf32> to vector<1x64x64xf32>
    tpu.vector_store %arg4[%c0_7, %c0_8, %c0_9], %18 {strides = array<i32>} : memref<1x64x64xf32, #tpu.memory_space<vmem>>, vector<1x64x64xf32>,
    return
  }
  func.func @transform_0(%arg0: i32) -> (i32, i32, i32) {
    %c0_i32 = arith.constant 0 : i32
    %c0_i32_0 = arith.constant 0 : i32
    %c0_i32_1 = arith.constant 0 : i32
    return %arg0, %c0_i32, %c0_i32_0 : i32, i32, i32
  }
  func.func @transform_1(%arg0: i32) -> (i32, i32) {
    %c0_i32 = arith.constant 0 : i32
    %c0_i32_0 = arith.constant 0 : i32
    %c0_i32_1 = arith.constant 0 : i32
    return %c0_i32, %c0_i32_0 : i32, i32
  }
  func.func @transform_2(%arg0: i32) -> (i32, i32) {
    %c0_i32 = arith.constant 0 : i32
    %c0_i32_0 = arith.constant 0 : i32
    %c0_i32_1 = arith.constant 0 : i32
    return %c0_i32, %c0_i32_0 : i32, i32
  }
  func.func @transform_3(%arg0: i32) -> (i32, i32, i32) {
    %c0_i32 = arith.constant 0 : i32
    %c0_i32_0 = arith.constant 0 : i32
    %c0_i32_1 = arith.constant 0 : i32
    return %arg0, %c0_i32, %c0_i32_0 : i32, i32, i32
  }
}

module attributes {stable_mosaic.version = 11 : i64} {
  func.func @mlp_softmax_kernel(%arg0: i32, %arg1: memref<2x512xbf16, #tpu.memory_space<vmem>>, %arg2: memref<512x1024xbf16, #tpu.memory_space<vmem>>, %arg3: memref<1x1024xf32, #tpu.memory_space<vmem>>, %arg4: memref<1024x2xbf16, #tpu.memory_space<vmem>>, %arg5: memref<1x2xf32, #tpu.memory_space<vmem>>, %arg6: memref<2x2xf32, #tpu.memory_space<vmem>>, %arg7: memref<2x1024xf32, #tpu.memory_space<vmem>>) attributes {dimension_semantics = [#tpu.dimension_semantics<arbitrary>], iteration_bounds = array<i64: 2>, scalar_prefetch = 0 : i64, scratch_operands = 1 : i64, tpu.core_type = #tpu.core_type<tc>, window_params = [{transform_indices = @transform_0, window_bounds = array<i64: 2, 512>}, {transform_indices = @transform_1, window_bounds = array<i64: 512, 1024>}, {pipeline_mode = #tpu.pipeline_mode<synchronous>, transform_indices = @transform_2, window_bounds = array<i64: 1, 1024>}, {pipeline_mode = #tpu.pipeline_mode<synchronous>, transform_indices = @transform_3, window_bounds = array<i64: 1024, 2>}, {pipeline_mode = #tpu.pipeline_mode<synchronous>, transform_indices = @transform_4, window_bounds = array<i64: 1, 2>}, {pipeline_mode = #tpu.pipeline_mode<synchronous>, transform_indices = @transform_5, window_bounds = array<i64: 2, 2>}]} {
    %c0_i32 = arith.constant 0 : i32
    %0 = arith.cmpi eq, %arg0, %c0_i32 : i32
    %1 = arith.extui %0 : i1 to i32
    %c0_i32_0 = arith.constant 0 : i32
    %2 = arith.cmpi ne, %1, %c0_i32_0 : i32
    scf.if %2 {
      %cst_9 = arith.constant 0.000000e+00 : f32
      %12 = vector.broadcast %cst_9 : f32 to vector<2x1024xf32>
      %c0_10 = arith.constant 0 : index
      %c0_11 = arith.constant 0 : index
      %13 = vector.load %arg7[%c0_10, %c0_11] : memref<2x1024xf32, #tpu.memory_space<vmem>>, vector<2x1024xf32>
      tpu.vector_store %arg7[%c0_10, %c0_11], %12 {strides = array<i32>} : memref<2x1024xf32, #tpu.memory_space<vmem>>, vector<2x1024xf32>,
    } else {
    }
    %c0 = arith.constant 0 : index
    %c0_1 = arith.constant 0 : index
    %3 = vector.load %arg7[%c0, %c0_1] : memref<2x1024xf32, #tpu.memory_space<vmem>>, vector<2x1024xf32>
    %c0_2 = arith.constant 0 : index
    %c0_3 = arith.constant 0 : index
    %4 = vector.load %arg1[%c0_2, %c0_3] : memref<2x512xbf16, #tpu.memory_space<vmem>>, vector<2x512xbf16>
    %c0_4 = arith.constant 0 : index
    %c0_5 = arith.constant 0 : index
    %5 = vector.load %arg2[%c0_4, %c0_5] : memref<512x1024xbf16, #tpu.memory_space<vmem>>, vector<512x1024xbf16>
    %cst = arith.constant dense<0.000000e+00> : vector<2x1024xf32>
    %6 = tpu.matmul %4, %5, %cst {dimension_numbers = #tpu.dot_dimension_numbers<[1], [0], [0], [1], [0, 0, 1, 1], [], []>} : vector<2x512xbf16>, vector<512x1024xbf16>, vector<2x1024xf32> -> vector<2x1024xf32>
    %7 = arith.addf %3, %6 : vector<2x1024xf32>
    %c0_6 = arith.constant 0 : index
    %c0_7 = arith.constant 0 : index
    %8 = vector.load %arg7[%c0_6, %c0_7] : memref<2x1024xf32, #tpu.memory_space<vmem>>, vector<2x1024xf32>
    tpu.vector_store %arg7[%c0_6, %c0_7], %7 {strides = array<i32>} : memref<2x1024xf32, #tpu.memory_space<vmem>>, vector<2x1024xf32>,
    %c1_i32 = arith.constant 1 : i32
    %9 = arith.cmpi eq, %arg0, %c1_i32 : i32
    %10 = arith.extui %9 : i1 to i32
    %c0_i32_8 = arith.constant 0 : i32
    %11 = arith.cmpi ne, %10, %c0_i32_8 : i32
    scf.if %11 {
      %c0_9 = arith.constant 0 : index
      %c0_10 = arith.constant 0 : index
      %12 = vector.load %arg7[%c0_9, %c0_10] : memref<2x1024xf32, #tpu.memory_space<vmem>>, vector<2x1024xf32>
      %c0_11 = arith.constant 0 : index
      %c0_12 = arith.constant 0 : index
      %13 = vector.load %arg3[%c0_11, %c0_12] : memref<1x1024xf32, #tpu.memory_space<vmem>>, vector<1x1024xf32>
      %14 = vector.broadcast %13 : vector<1x1024xf32> to vector<2x1024xf32>
      %15 = arith.addf %12, %14 : vector<2x1024xf32>
      %cst_13 = arith.constant 0.000000e+00 : f32
      %16 = vector.broadcast %cst_13 : f32 to vector<2x1024xf32>
      %17 = arith.maximumf %15, %16 : vector<2x1024xf32>
      %18 = arith.truncf %17 : vector<2x1024xf32> to vector<2x1024xbf16>
      %c0_14 = arith.constant 0 : index
      %c0_15 = arith.constant 0 : index
      %19 = vector.load %arg4[%c0_14, %c0_15] : memref<1024x2xbf16, #tpu.memory_space<vmem>>, vector<1024x2xbf16>
      %cst_16 = arith.constant dense<0.000000e+00> : vector<2x2xf32>
      %20 = tpu.matmul %18, %19, %cst_16 {dimension_numbers = #tpu.dot_dimension_numbers<[1], [0], [0], [1], [0, 0, 1, 1], [], []>} : vector<2x1024xbf16>, vector<1024x2xbf16>, vector<2x2xf32> -> vector<2x2xf32>
      %c0_17 = arith.constant 0 : index
      %c0_18 = arith.constant 0 : index
      %21 = vector.load %arg5[%c0_17, %c0_18] : memref<1x2xf32, #tpu.memory_space<vmem>>, vector<1x2xf32>
      %22 = vector.broadcast %21 : vector<1x2xf32> to vector<2x2xf32>
      %23 = arith.addf %20, %22 : vector<2x2xf32>
      %cst_19 = arith.constant dense<0xFF800000> : vector<2xf32>
      %24 = vector.multi_reduction <maximumf>, %23, %cst_19 [1] : vector<2x2xf32> to vector<2xf32>
      %25 = vector.shape_cast %24 : vector<2xf32> to vector<2x1xf32>
      %26 = vector.broadcast %25 : vector<2x1xf32> to vector<2x2xf32>
      %27 = arith.subf %23, %26 : vector<2x2xf32>
      %28 = math.exp %27 : vector<2x2xf32>
      %cst_20 = arith.constant dense<0.000000e+00> : vector<2xf32>
      %29 = vector.multi_reduction <add>, %28, %cst_20 [1] : vector<2x2xf32> to vector<2xf32>
      %30 = vector.shape_cast %29 : vector<2xf32> to vector<2x1xf32>
      %31 = vector.broadcast %30 : vector<2x1xf32> to vector<2x2xf32>
      %32 = arith.divf %28, %31 : vector<2x2xf32>
      %c0_21 = arith.constant 0 : index
      %c0_22 = arith.constant 0 : index
      %33 = vector.load %arg6[%c0_21, %c0_22] : memref<2x2xf32, #tpu.memory_space<vmem>>, vector<2x2xf32>
      tpu.vector_store %arg6[%c0_21, %c0_22], %32 {strides = array<i32>} : memref<2x2xf32, #tpu.memory_space<vmem>>, vector<2x2xf32>,
    } else {
    }
    return
  }
  func.func @transform_0(%arg0: i32) -> (i32, i32) {
    %c0_i32 = arith.constant 0 : i32
    %c0_i32_0 = arith.constant 0 : i32
    return %c0_i32, %arg0 : i32, i32
  }
  func.func @transform_1(%arg0: i32) -> (i32, i32) {
    %c0_i32 = arith.constant 0 : i32
    %c0_i32_0 = arith.constant 0 : i32
    return %arg0, %c0_i32 : i32, i32
  }
  func.func @transform_2(%arg0: i32) -> (i32, i32) {
    %c0_i32 = arith.constant 0 : i32
    %c0_i32_0 = arith.constant 0 : i32
    %c0_i32_1 = arith.constant 0 : i32
    return %c0_i32, %c0_i32_0 : i32, i32
  }
  func.func @transform_3(%arg0: i32) -> (i32, i32) {
    %c0_i32 = arith.constant 0 : i32
    %c0_i32_0 = arith.constant 0 : i32
    %c0_i32_1 = arith.constant 0 : i32
    return %c0_i32, %c0_i32_0 : i32, i32
  }
  func.func @transform_4(%arg0: i32) -> (i32, i32) {
    %c0_i32 = arith.constant 0 : i32
    %c0_i32_0 = arith.constant 0 : i32
    %c0_i32_1 = arith.constant 0 : i32
    return %c0_i32, %c0_i32_0 : i32, i32
  }
  func.func @transform_5(%arg0: i32) -> (i32, i32) {
    %c0_i32 = arith.constant 0 : i32
    %c0_i32_0 = arith.constant 0 : i32
    %c0_i32_1 = arith.constant 0 : i32
    return %c0_i32, %c0_i32_0 : i32, i32
  }
}

</mosaic_0001>

<bundles_post_ra>
// kernel: cnn_forward.3
= control target key start
LH: loop header
LB: loop body
LE: loop exit
PB: predicated region body
PF: predicated region fallthrough
CT: control target
= control target key end

     0   :  { %8 = vsyncpa [#allocation3], 0  ;;  %s1274_s0 = inlined_call_operand.vmem [shape: bf16[2,256,32], index: 0, kind: input, shape index: {}]   ;;  %s1275_s1 = inlined_call_operand.hbm [shape: bf16[32,32], index: 1, kind: input, shape index: {}]   ;;  %s1276_s2 = inlined_call_operand.hbm [shape: f32[3,32], index: 2, kind: input, shape index: {}]   ;;  %s1277_s3 = inlined_call_operand.vmem [shape: f32[2,256,32], index: 3, kind: output, shape index: {}]  }
   0x1   :  { %9 = vsyncpa [#allocation5], 0  ;;  %s1006_s12 = smov 0  }
   0x2 LB: > { %s1012_s13 = sadd.s32 4294967295, %s980_s12   ;;  %p758_p0 = scmp.ge.s32.totalorder %s980_s12, 1  ;;  %s980_s12 = sphi %s1006_s12, %s15_s12  }
   0x3   : > { %p114_p1 = scmp.lt.s32.totalorder %s980_s12, 3  ;;  %s982_s14 = smov [#allocation2]  }
   0x4   : > { %s126_s15 = sshll.u32 %s982_s14, 4  ;;  %p880_p3 = scmp.eq.s32.totalorder %s1012_s13, 0  ;;  %s127_s15 = int_to_ptr.vmem [resolvable:$true] %s126_s15 }
   0x5   : > { %p1016_p2 = pnand %p758_p0, %p114_p1  ;;  %s983_s17 = smov [#allocation4]  }
   0x6   : > { %s140_s18 = sshll.u32 %s983_s17, 4  ;;  %s925_s20 = scalar_lea.vmem %s127_s15, 256  ;;  %s141_s18 = int_to_ptr.vmem [resolvable:$true] %s140_s18 }
   0x7   : > { %p873_p4 = pneg %p1016_p2  ;;  %p926_p7 = scmp.ne.s32.totalorder %s127_s15, %s925_s20 }
   0x8   : > { %p933_p10 = scmp.lt.s32.totalorder %s127_s15, %s127_s15  ;;  %p934_p11 = scmp.lt.s32.totalorder %s925_s20, %s925_s20 }
   0x9   : > { %p1025_p5 = pnand %p880_p3, %p873_p4 }
   0xa   : > { %p935_p12 = por %p934_p11, %p933_p10 }
   0xb   : > { %p916_p6 = pneg %p1025_p5 }
   0xd   : > { %p928_p8 = pnand %p926_p7, %p916_p6 }
   0xf   : > { %p929_p9 = pneg %p928_p8 }
  0x11   : > { %p936_p13 = pnand %p935_p12, %p929_p9 }
  0x13   : > { %939 = shalt.err (!%p936_p13)
}
  0x14   : > { %s984_s21 = smov 64   ;;  %s985_s22 = smov 4  }
  0x15   : > { %876 = dma.hbm_to_vmem [thread:$0]  (!%p1025_p5), %s1275_s1, 256, %s127_s15, [#allocation3], %s984_s21, %s984_s21, %s985_s22  }
  0x16   : > { %s951_s25 = scalar_lea.vmem %s141_s18, 64  ;;  %p959_p7 = scmp.lt.s32.totalorder %s141_s18, %s141_s18 }
  0x17   : > { %p952_p0 = scmp.ne.s32.totalorder %s141_s18, %s951_s25  ;;  %p960_p8 = scmp.lt.s32.totalorder %s951_s25, %s951_s25 }
  0x19   : > { %p954_p1 = pnand %p952_p0, %p916_p6  ;;  %p961_p10 = por %p960_p8, %p959_p7 }
  0x1b   : > { %p955_p4 = pneg %p954_p1 }
  0x1d   : > { %p962_p9 = pnand %p961_p10, %p955_p4 }
  0x1f   : > { %965 = shalt.err (!%p962_p9)
}
  0x20   : > { %879 = dma.hbm_to_vmem [thread:$0]  (!%p1025_p5), %s1276_s2, 64, %s141_s18, [#allocation5]  }
  0x21   : > { %161 = sbr.rel (%p1016_p2) target bundleno = 283 (0x11b), region = 32 }
  0x26   : > { %971 = dma.done.wait (%p880_p3), [#allocation3], 256  }
  0x27   : > { %973 = vsyncadd (%p880_p3), [#allocation3], 4294967040 }
  0x28   : > { %975 = dma.done.wait (%p880_p3), [#allocation5], 64  }
  0x29   : > { %977 = vsyncadd (%p880_p3), [#allocation5], 4294967232  ;;  %p189_p6 = scmp.lt.s32.totalorder %s1012_s13, 1  ;;  %v896_v0 = vld [vmem:[#allocation2 + $0x8] sm:$0xff]   ;;  %v897_v1 = vld [vmem:[#allocation2] sm:$0xff]   ;;  %vm333_vm0 = vcmask 261120   ;;  %v237_v18 = vlaneseq }
  0x2a   : > { %825 = vmatprep.subr.bf16.mxu0 %v896_v0  ;;  %861 = vmatprep.subr.bf16.mxu1 %v896_v0  ;;  %v236_v21 = vld [vmem:[#allocation4] sm:$0x7] }
  0x2b   : > { %s1281_s13 = smov (!%p189_p6, %s1012_s13), 1  ;;  %826 = vmatpush3.bf16.msra.mxu0 %v896_v0  ;;  %863 = vmatpush3.bf16.msra.mxu1 %v896_v0  ;;  %v238_v19 = vshrl.u32 %v237_v18, 7 }
  0x2c   : > { %s805_s28 = sshll.u32 %s1281_s13, 7  ;;  %827 = vmatprep.subr.bf16.mxu0 %v897_v1  ;;  %862 = vmatprep.subr.bf16.mxu1 %v897_v1  ;;  %s806_s5 = sshll.u32 %s1281_s13, 8 }
  0x2d   : > { %s1065_s4 = scalar_lea.vmem %s1274_s0, %s805_s28  ;;  %v239_v20 = vsub.s32 0, %v238_v19  ;;  %v577_v23 = vsub.s32 1, %v238_v19  ;;  %v613_v24 = vsub.s32 2, %v238_v19  ;;  %s1115_s8 = scalar_lea.vmem %s1277_s3, %s806_s5 }
  0x2e   : > { %v898_v2 = vld [vmem:[%s1065_s4] sm:$0xff]   ;;  %v900_v4 = vld [vmem:[%s1065_s4 + $0x8] sm:$0xff]   ;;  %v902_v6 = vld [vmem:[%s1065_s4 + $0x10] sm:$0xff]  }
  0x2f   : > { %v899_v3 = vld [vmem:[%s1065_s4 + $0x40] sm:$0xff]   ;;  %829 = vmatprep.mubr.msk.bf16.mxu0 %vm333_vm0, %v898_v2  ;;  %v901_v5 = vld [vmem:[%s1065_s4 + $0x48] sm:$0xff]   ;;  %828 = vmatpush3.bf16.msra.mxu0 %v897_v1  ;;  %v903_v7 = vld [vmem:[%s1065_s4 + $0x50] sm:$0xff]   ;;  %v1099_v22 = vrot.slane %v236_v21, %v239_v20  ;;  %v1102_v28 = vrot.slane %v236_v21, %v577_v23  ;;  %v1105_v30 = vrot.slane %v236_v21, %v613_v24 }
  0x30   : > { %845 = vmatprep.mubr.msk.bf16.mxu1 %vm333_vm0, %v899_v3  ;;  %864 = vmatpush3.bf16.msra.mxu1 %v897_v1  ;;  %v904_v8 = vld [vmem:[%s1065_s4 + $0x18] sm:$0xff]   ;;  %v906_v10 = vld [vmem:[%s1065_s4 + $0x20] sm:$0xff]   ;;  %v908_v12 = vld [vmem:[%s1065_s4 + $0x28] sm:$0xff]  }
  0x31   : > { %v905_v9 = vld [vmem:[%s1065_s4 + $0x58] sm:$0xff]   ;;  %v907_v11 = vld [vmem:[%s1065_s4 + $0x60] sm:$0xff]   ;;  %v909_v13 = vld [vmem:[%s1065_s4 + $0x68] sm:$0xff]  }
  0x32   : > { %830 = vmatmul.mubr.msk.bf16.vlgmr.msra.gmra.mxu0 %vm333_vm0, %v900_v4  ;;  %v910_v14 = vld [vmem:[%s1065_s4 + $0x30] sm:$0xff]   ;;  %v912_v16 = vld [vmem:[%s1065_s4 + $0x38] sm:$0xff]  }
  0x33   : > { %846 = vmatmul.mubr.msk.bf16.vlgmr.msra.gmra.mxu1 %vm333_vm0, %v901_v5  ;;  %833 = vmatprep.mubr.msk.bf16.mxu0 %vm333_vm0, %v902_v6  ;;  %v911_v15 = vld [vmem:[%s1065_s4 + $0x70] sm:$0xff]   ;;  %v913_v17 = vld [vmem:[%s1065_s4 + $0x78] sm:$0xff]  }
  0x34   : > { %849 = vmatprep.mubr.msk.bf16.mxu1 %vm333_vm0, %v903_v7 }
  0x3a   : > { %834 = vmatmul.mubr.msk.bf16.gmra.mxu0 %vm333_vm0, %v904_v8 }
  0x3b   : > { %850 = vmatmul.mubr.msk.bf16.gmra.mxu1 %vm333_vm0, %v905_v9  ;;  %837 = vmatprep.mubr.msk.bf16.mxu0 %vm333_vm0, %v906_v10 }
  0x3c   : > { %853 = vmatprep.mubr.msk.bf16.mxu1 %vm333_vm0, %v907_v11 }
  0x42   : > { %838 = vmatmul.mubr.msk.bf16.gmra.mxu0 %vm333_vm0, %v908_v12 }
  0x43   : > { %854 = vmatmul.mubr.msk.bf16.gmra.mxu1 %vm333_vm0, %v909_v13  ;;  %841 = vmatprep.mubr.msk.bf16.mxu0 %vm333_vm0, %v910_v14 }
  0x44   : > { %857 = vmatprep.mubr.msk.bf16.mxu1 %vm333_vm0, %v911_v15 }
  0x4a   : > { %842 = vmatmul.mubr.msk.bf16.gmra.mxu0 %vm333_vm0, %v912_v16 }
  0x4b   : > { %858 = vmatmul.mubr.msk.bf16.gmra.mxu1 %vm333_vm0, %v913_v17 }
  0xf2   : > { %v831_v25 = vpop.f32.mrf.mxu0 }
  0xf3   : > { %v847_v26 = vpop.f32.mrf.mxu1  ;;  %v425_v27 = vadd.f32 %v831_v25, %v1099_v22 }
  0xf4   : > { %v489_v29 = vadd.f32 %v847_v26, %v1099_v22  ;;  %v416_v31 = vpop.f32.mrf.mxu0 }
  0xf5   : > { %v480_v32 = vpop.f32.mrf.mxu1  ;;  %v545_v33 = vmax.f32 %v425_v27, 0.0  ;;  %v417_v35 = vadd.f32 %v416_v31, %v1099_v22 }
  0xf6   : > { %v561_v34 = vmax.f32 %v489_v29, 0.0  ;;  %v481_v36 = vadd.f32 %v480_v32, %v1099_v22  ;;  %v832_v37 = vpop.f32.mrf.mxu0 }
  0xf7   : > { %v848_v38 = vpop.f32.mrf.mxu1  ;;  %v581_v39 = vmul.f32 %v1102_v28, %v545_v33  ;;  %v543_v41 = vmax.f32 %v417_v35, 0.0  ;;  %v428_v43 = vadd.f32 %v832_v37, %v1099_v22 }
  0xf8   : > { %v597_v40 = vmul.f32 %v1102_v28, %v561_v34  ;;  %v559_v42 = vmax.f32 %v481_v36, 0.0  ;;  %v492_v44 = vadd.f32 %v848_v38, %v1099_v22  ;;  %v419_v45 = vpop.f32.mrf.mxu0 }
  0xf9   : > { %v483_v46 = vpop.f32.mrf.mxu1  ;;  %v617_v47 = vadd.f32 %v1105_v30, %v581_v39  ;;  %v579_v49 = vmul.f32 %v1102_v28, %v543_v41  ;;  %v546_v51 = vmax.f32 %v428_v43, 0.0  ;;  %v420_v53 = vadd.f32 %v419_v45, %v1099_v22 }
  0xfa   : > { %v633_v48 = vadd.f32 %v1105_v30, %v597_v40  ;;  %v595_v50 = vmul.f32 %v1102_v28, %v559_v42  ;;  %v562_v52 = vmax.f32 %v492_v44, 0.0  ;;  %v484_v54 = vadd.f32 %v483_v46, %v1099_v22  ;;  %v835_v55 = vpop.f32.mrf.mxu0 }
  0xfb   : > { %v851_v56 = vpop.f32.mrf.mxu1  ;;  %649 = vst.msk [vmem:[%s1115_s8 + $0x10] sm:$0xff] %vm333_vm0, %v617_v47  ;;  %v615_v57 = vadd.f32 %v1105_v30, %v579_v49  ;;  %v441_v59 = vadd.f32 %v835_v55, %v1099_v22  ;;  %v582_v61 = vmul.f32 %v1102_v28, %v546_v51  ;;  %v544_v63 = vmax.f32 %v420_v53, 0.0 }
  0xfc   : > { %665 = vst.msk [vmem:[%s1115_s8 + $0x90] sm:$0xff] %vm333_vm0, %v633_v48  ;;  %v631_v58 = vadd.f32 %v1105_v30, %v595_v50  ;;  %v505_v60 = vadd.f32 %v851_v56, %v1099_v22  ;;  %v598_v62 = vmul.f32 %v1102_v28, %v562_v52  ;;  %v560_v0 = vmax.f32 %v484_v54, 0.0  ;;  %v432_v1 = vpop.f32.mrf.mxu0 }
  0xfd   : > { %v496_v2 = vpop.f32.mrf.mxu1  ;;  %647 = vst.msk [vmem:[%s1115_s8] sm:$0xff] %vm333_vm0, %v615_v57  ;;  %v549_v3 = vmax.f32 %v441_v59, 0.0  ;;  %v433_v5 = vadd.f32 %v432_v1, %v1099_v22  ;;  %v618_v7 = vadd.f32 %v1105_v30, %v582_v61  ;;  %v580_v9 = vmul.f32 %v1102_v28, %v544_v63 }
  0xfe   : > { %663 = vst.msk [vmem:[%s1115_s8 + $0x80] sm:$0xff] %vm333_vm0, %v631_v58  ;;  %v565_v4 = vmax.f32 %v505_v60, 0.0  ;;  %v497_v6 = vadd.f32 %v496_v2, %v1099_v22  ;;  %v634_v8 = vadd.f32 %v1105_v30, %v598_v62  ;;  %v596_v10 = vmul.f32 %v1102_v28, %v560_v0  ;;  %v836_v11 = vpop.f32.mrf.mxu0 }
  0xff   : > { %v852_v12 = vpop.f32.mrf.mxu1  ;;  %v585_v13 = vmul.f32 %v1102_v28, %v549_v3  ;;  %v547_v15 = vmax.f32 %v433_v5, 0.0  ;;  %650 = vst.msk [vmem:[%s1115_s8 + $0x18] sm:$0xff] %vm333_vm0, %v618_v7  ;;  %v616_v17 = vadd.f32 %v1105_v30, %v580_v9  ;;  %v444_v19 = vadd.f32 %v836_v11, %v1099_v22 }
 0x100   : > { %v601_v14 = vmul.f32 %v1102_v28, %v565_v4  ;;  %v563_v16 = vmax.f32 %v497_v6, 0.0  ;;  %666 = vst.msk [vmem:[%s1115_s8 + $0x98] sm:$0xff] %vm333_vm0, %v634_v8  ;;  %v632_v18 = vadd.f32 %v1105_v30, %v596_v10  ;;  %v508_v20 = vadd.f32 %v852_v12, %v1099_v22  ;;  %v435_v21 = vpop.f32.mrf.mxu0 }
 0x101   : > { %v499_v23 = vpop.f32.mrf.mxu1  ;;  %v621_v24 = vadd.f32 %v1105_v30, %v585_v13  ;;  %v583_v26 = vmul.f32 %v1102_v28, %v547_v15  ;;  %648 = vst.msk [vmem:[%s1115_s8 + $0x8] sm:$0xff] %vm333_vm0, %v616_v17  ;;  %v550_v29 = vmax.f32 %v444_v19, 0.0  ;;  %v436_v32 = vadd.f32 %v435_v21, %v1099_v22 }
 0x102   : > { %v637_v25 = vadd.f32 %v1105_v30, %v601_v14  ;;  %v599_v27 = vmul.f32 %v1102_v28, %v563_v16  ;;  %664 = vst.msk [vmem:[%s1115_s8 + $0x88] sm:$0xff] %vm333_vm0, %v632_v18  ;;  %v566_v31 = vmax.f32 %v508_v20, 0.0  ;;  %v500_v33 = vadd.f32 %v499_v23, %v1099_v22  ;;  %v839_v34 = vpop.f32.mrf.mxu0 }
 0x103   : > { %v855_v35 = vpop.f32.mrf.mxu1  ;;  %653 = vst.msk [vmem:[%s1115_s8 + $0x30] sm:$0xff] %vm333_vm0, %v621_v24  ;;  %v619_v36 = vadd.f32 %v1105_v30, %v583_v26  ;;  %v457_v38 = vadd.f32 %v839_v34, %v1099_v22  ;;  %v586_v40 = vmul.f32 %v1102_v28, %v550_v29  ;;  %v548_v42 = vmax.f32 %v436_v32, 0.0 }
 0x104   : > { %669 = vst.msk [vmem:[%s1115_s8 + $0xb0] sm:$0xff] %vm333_vm0, %v637_v25  ;;  %v635_v37 = vadd.f32 %v1105_v30, %v599_v27  ;;  %v521_v39 = vadd.f32 %v855_v35, %v1099_v22  ;;  %v602_v41 = vmul.f32 %v1102_v28, %v566_v31  ;;  %v564_v43 = vmax.f32 %v500_v33, 0.0  ;;  %v448_v44 = vpop.f32.mrf.mxu0 }
 0x105   : > { %v512_v45 = vpop.f32.mrf.mxu1  ;;  %651 = vst.msk [vmem:[%s1115_s8 + $0x20] sm:$0xff] %vm333_vm0, %v619_v36  ;;  %v553_v46 = vmax.f32 %v457_v38, 0.0  ;;  %v449_v48 = vadd.f32 %v448_v44, %v1099_v22  ;;  %v622_v50 = vadd.f32 %v1105_v30, %v586_v40  ;;  %v584_v52 = vmul.f32 %v1102_v28, %v548_v42 }
 0x106   : > { %667 = vst.msk [vmem:[%s1115_s8 + $0xa0] sm:$0xff] %vm333_vm0, %v635_v37  ;;  %v569_v47 = vmax.f32 %v521_v39, 0.0  ;;  %v513_v49 = vadd.f32 %v512_v45, %v1099_v22  ;;  %v638_v51 = vadd.f32 %v1105_v30, %v602_v41  ;;  %v600_v53 = vmul.f32 %v1102_v28, %v564_v43  ;;  %v840_v54 = vpop.f32.mrf.mxu0 }
 0x107   : > { %v856_v55 = vpop.f32.mrf.mxu1  ;;  %v589_v56 = vmul.f32 %v1102_v28, %v553_v46  ;;  %v551_v58 = vmax.f32 %v449_v48, 0.0  ;;  %654 = vst.msk [vmem:[%s1115_s8 + $0x38] sm:$0xff] %vm333_vm0, %v622_v50  ;;  %v620_v60 = vadd.f32 %v1105_v30, %v584_v52  ;;  %v460_v62 = vadd.f32 %v840_v54, %v1099_v22 }
 0x108   : > { %v605_v57 = vmul.f32 %v1102_v28, %v569_v47  ;;  %v567_v59 = vmax.f32 %v513_v49, 0.0  ;;  %670 = vst.msk [vmem:[%s1115_s8 + $0xb8] sm:$0xff] %vm333_vm0, %v638_v51  ;;  %v636_v61 = vadd.f32 %v1105_v30, %v600_v53  ;;  %v524_v63 = vadd.f32 %v856_v55, %v1099_v22  ;;  %v451_v0 = vpop.f32.mrf.mxu0 }
 0x109   : > { %v515_v1 = vpop.f32.mrf.mxu1  ;;  %v625_v2 = vadd.f32 %v1105_v30, %v589_v56  ;;  %v587_v4 = vmul.f32 %v1102_v28, %v551_v58  ;;  %652 = vst.msk [vmem:[%s1115_s8 + $0x28] sm:$0xff] %vm333_vm0, %v620_v60  ;;  %v554_v6 = vmax.f32 %v460_v62, 0.0  ;;  %v452_v8 = vadd.f32 %v451_v0, %v1099_v22 }
 0x10a   : > { %v641_v3 = vadd.f32 %v1105_v30, %v605_v57  ;;  %v603_v5 = vmul.f32 %v1102_v28, %v567_v59  ;;  %668 = vst.msk [vmem:[%s1115_s8 + $0xa8] sm:$0xff] %vm333_vm0, %v636_v61  ;;  %v570_v7 = vmax.f32 %v524_v63, 0.0  ;;  %v516_v9 = vadd.f32 %v515_v1, %v1099_v22  ;;  %v843_v10 = vpop.f32.mrf.mxu0 }
 0x10b   : > { %v859_v11 = vpop.f32.mrf.mxu1  ;;  %657 = vst.msk [vmem:[%s1115_s8 + $0x50] sm:$0xff] %vm333_vm0, %v625_v2  ;;  %v623_v12 = vadd.f32 %v1105_v30, %v587_v4  ;;  %v473_v14 = vadd.f32 %v843_v10, %v1099_v22  ;;  %v590_v16 = vmul.f32 %v1102_v28, %v554_v6  ;;  %v552_v18 = vmax.f32 %v452_v8, 0.0 }
 0x10c   : > { %673 = vst.msk [vmem:[%s1115_s8 + $0xd0] sm:$0xff] %vm333_vm0, %v641_v3  ;;  %v639_v13 = vadd.f32 %v1105_v30, %v603_v5  ;;  %v537_v15 = vadd.f32 %v859_v11, %v1099_v22  ;;  %v606_v17 = vmul.f32 %v1102_v28, %v570_v7  ;;  %v568_v19 = vmax.f32 %v516_v9, 0.0  ;;  %v464_v20 = vpop.f32.mrf.mxu0 }
 0x10d   : > { %v528_v21 = vpop.f32.mrf.mxu1  ;;  %655 = vst.msk [vmem:[%s1115_s8 + $0x40] sm:$0xff] %vm333_vm0, %v623_v12  ;;  %v557_v23 = vmax.f32 %v473_v14, 0.0  ;;  %v465_v25 = vadd.f32 %v464_v20, %v1099_v22  ;;  %v626_v27 = vadd.f32 %v1105_v30, %v590_v16  ;;  %v588_v31 = vmul.f32 %v1102_v28, %v552_v18 }
 0x10e   : > { %671 = vst.msk [vmem:[%s1115_s8 + $0xc0] sm:$0xff] %vm333_vm0, %v639_v13  ;;  %v573_v24 = vmax.f32 %v537_v15, 0.0  ;;  %v529_v26 = vadd.f32 %v528_v21, %v1099_v22  ;;  %v642_v29 = vadd.f32 %v1105_v30, %v606_v17  ;;  %v604_v32 = vmul.f32 %v1102_v28, %v568_v19  ;;  %v844_v33 = vpop.f32.mrf.mxu0 }
 0x10f   : > { %v860_v34 = vpop.f32.mrf.mxu1  ;;  %v593_v35 = vmul.f32 %v1102_v28, %v557_v23  ;;  %v555_v37 = vmax.f32 %v465_v25, 0.0  ;;  %658 = vst.msk [vmem:[%s1115_s8 + $0x58] sm:$0xff] %vm333_vm0, %v626_v27  ;;  %v624_v39 = vadd.f32 %v1105_v30, %v588_v31  ;;  %v476_v41 = vadd.f32 %v844_v33, %v1099_v22 }
 0x110   : > { %v609_v36 = vmul.f32 %v1102_v28, %v573_v24  ;;  %v571_v38 = vmax.f32 %v529_v26, 0.0  ;;  %674 = vst.msk [vmem:[%s1115_s8 + $0xd8] sm:$0xff] %vm333_vm0, %v642_v29  ;;  %v640_v40 = vadd.f32 %v1105_v30, %v604_v32  ;;  %v540_v42 = vadd.f32 %v860_v34, %v1099_v22  ;;  %v467_v43 = vpop.f32.mrf.mxu0 }
 0x111   : > { %v531_v44 = vpop.f32.mrf.mxu1  ;;  %v629_v45 = vadd.f32 %v1105_v30, %v593_v35  ;;  %v591_v47 = vmul.f32 %v1102_v28, %v555_v37  ;;  %656 = vst.msk [vmem:[%s1115_s8 + $0x48] sm:$0xff] %vm333_vm0, %v624_v39  ;;  %v558_v49 = vmax.f32 %v476_v41, 0.0  ;;  %v468_v51 = vadd.f32 %v467_v43, %v1099_v22 }
 0x112   : > { %v645_v46 = vadd.f32 %v1105_v30, %v609_v36  ;;  %v607_v48 = vmul.f32 %v1102_v28, %v571_v38  ;;  %672 = vst.msk [vmem:[%s1115_s8 + $0xc8] sm:$0xff] %vm333_vm0, %v640_v40  ;;  %v574_v50 = vmax.f32 %v540_v42, 0.0  ;;  %v532_v52 = vadd.f32 %v531_v44, %v1099_v22 }
 0x113   : > { %661 = vst.msk [vmem:[%s1115_s8 + $0x70] sm:$0xff] %vm333_vm0, %v629_v45  ;;  %v627_v53 = vadd.f32 %v1105_v30, %v591_v47  ;;  %v594_v55 = vmul.f32 %v1102_v28, %v558_v49  ;;  %v556_v57 = vmax.f32 %v468_v51, 0.0 }
 0x114   : > { %677 = vst.msk [vmem:[%s1115_s8 + $0xf0] sm:$0xff] %vm333_vm0, %v645_v46  ;;  %v643_v54 = vadd.f32 %v1105_v30, %v607_v48  ;;  %v610_v56 = vmul.f32 %v1102_v28, %v574_v50  ;;  %v572_v58 = vmax.f32 %v532_v52, 0.0 }
 0x115   : > { %659 = vst.msk [vmem:[%s1115_s8 + $0x60] sm:$0xff] %vm333_vm0, %v627_v53  ;;  %v630_v22 = vadd.f32 %v1105_v30, %v594_v55  ;;  %v592_v60 = vmul.f32 %v1102_v28, %v556_v57 }
 0x116   : > { %675 = vst.msk [vmem:[%s1115_s8 + $0xe0] sm:$0xff] %vm333_vm0, %v643_v54  ;;  %v646_v59 = vadd.f32 %v1105_v30, %v610_v56  ;;  %v608_v61 = vmul.f32 %v1102_v28, %v572_v58 }
 0x117   : > { %662 = vst.msk [vmem:[%s1115_s8 + $0x78] sm:$0xff] %vm333_vm0, %v630_v22  ;;  %v628_v62 = vadd.f32 %v1105_v30, %v592_v60 }
 0x118   : > { %678 = vst.msk [vmem:[%s1115_s8 + $0xf8] sm:$0xff] %vm333_vm0, %v646_v59  ;;  %v644_v63 = vadd.f32 %v1105_v30, %v608_v61 }
 0x119   : > { %660 = vst.msk [vmem:[%s1115_s8 + $0x68] sm:$0xff] %vm333_vm0, %v628_v62 }
 0x11a   : > { %676 = vst.msk [vmem:[%s1115_s8 + $0xe8] sm:$0xff] %vm333_vm0, %v644_v63 }
 0x11b PF: > { %s15_s12 = sadd.s32 1, %s980_s12  }
 0x11c   : > { %p12_p2 = scmp.ge.s32.totalorder %s15_s12, 4  }
 0x11e   :  { %14 = sbr.rel (!%p12_p2) target bundleno = 2 (0x2), region = 71 }
 0x123   :  { %700 = vsyncpa [#allocation3], 1 }
 0x124   :  { %702 = vsyncpa [#allocation3 + $0x1], 1 }
 0x125   :  { %703 = vsyncpa [#allocation5], 1 }

// kernel: cnn_forward.4
= control target key start
LH: loop header
LB: loop body
LE: loop exit
PB: predicated region body
PF: predicated region fallthrough
CT: control target
= control target key end

     0   :  { %s1492_s12 = smov 0   ;;  %s1770_s0 = inlined_call_operand.vmem [shape: bf16[2,64,800], index: 0, kind: input, shape index: {}]   ;;  %s1771_s1 = inlined_call_operand.vmem [shape: bf16[800,64], index: 1, kind: input, shape index: {}]   ;;  %s1772_s2 = inlined_call_operand.vmem [shape: f32[3,64], index: 2, kind: input, shape index: {}]   ;;  %s1773_s3 = inlined_call_operand.vmem [shape: f32[2,64,64], index: 3, kind: output, shape index: {}]  }
   0x1 LB: > { %s1118_s13 = sadd.s32 4294967295, %s1470_s12   ;;  %p1122_p0 = scmp.ge.s32.totalorder %s1470_s12, 1  ;;  %s1470_s12 = sphi %s1492_s12, %s13_s12  }
   0x2   : > { %p137_p1 = scmp.lt.s32.totalorder %s1470_s12, 3 }
   0x4   : > { %p138_p2 = pnand %p1122_p0, %p137_p1 }
   0x5   : > { %p161_p3 = scmp.lt.s32.totalorder (!%p138_p2), %s1118_s13, 1 }
   0x6   : > { %141 = sbr.rel (%p138_p2) target bundleno = 306 (0x132), region = 32 }
   0xb   : > { %v1374_v0 = vld [vmem:[%s1771_s1 + $0x78] sm:$0xff]   ;;  %v1378_v4 = vld [vmem:[%s1771_s1 + $0x70] sm:$0xff]   ;;  %v1382_v8 = vld [vmem:[%s1771_s1 + $0x68] sm:$0xff]   ;;  %s1775_s13 = smov (!%p161_p3, %s1118_s13), 1  ;;  %vm749_vm0 = vcmask 261120   ;;  %vm1054_vm1 = vcmask 523264  }
   0xc   : > { %v1375_v1 = vld [vmem:[%s1771_s1 + $0xf8] sm:$0xff]   ;;  %1211 = vmatprep.subr.bf16.mxu0 %v1374_v0  ;;  %v1379_v5 = vld [vmem:[%s1771_s1 + $0xf0] sm:$0xff]   ;;  %v1383_v9 = vld [vmem:[%s1771_s1 + $0xe8] sm:$0xff]   ;;  %s1365_s16 = smul.u32 224, %s1775_s13  ;;  %s1210_s20 = sshll.u32 %s1775_s13, 6 }
   0xd   : > { %v1376_v2 = vld [vmem:[%s1771_s1 + $0x38] sm:$0xff]   ;;  %1251 = vmatprep.subr.bf16.mxu1 %v1375_v1  ;;  %v1380_v6 = vld [vmem:[%s1771_s1 + $0x30] sm:$0xff]   ;;  %v1384_v10 = vld [vmem:[%s1771_s1 + $0x28] sm:$0xff]   ;;  %s1731_s13 = scalar_lea.vmem %s1773_s3, %s1210_s20 }
   0xe   : > { %v1377_v3 = vld [vmem:[%s1771_s1 + $0xb8] sm:$0xff]   ;;  %1212 = vmatpush3.bf16.msra.mxu0 %v1376_v2  ;;  %v1381_v7 = vld [vmem:[%s1771_s1 + $0xb0] sm:$0xff]   ;;  %v1385_v11 = vld [vmem:[%s1771_s1 + $0xa8] sm:$0xff]   ;;  %s1600_s27 = scalar_lea.vmem %s1770_s0, %s1365_s16 }
   0xf   : > { %1252 = vmatpush3.bf16.msra.mxu1 %v1377_v3  ;;  %1213 = vmatprep.subr.bf16.mxu0 %v1378_v4  ;;  %v1386_v12 = vld [vmem:[%s1771_s1 + $0x60] sm:$0xff]   ;;  %v1390_v16 = vld [vmem:[%s1771_s1 + $0x58] sm:$0xff]   ;;  %v1394_v20 = vld [vmem:[%s1771_s1 + $0x50] sm:$0xff]  }
  0x10   : > { %1253 = vmatprep.subr.bf16.mxu1 %v1379_v5  ;;  %v1387_v13 = vld [vmem:[%s1771_s1 + $0xe0] sm:$0xff]   ;;  %v1391_v17 = vld [vmem:[%s1771_s1 + $0xd8] sm:$0xff]   ;;  %v1395_v21 = vld [vmem:[%s1771_s1 + $0xd0] sm:$0xff]  }
  0x11   : > { %v1388_v14 = vld [vmem:[%s1771_s1 + $0x20] sm:$0xff]   ;;  %v1392_v18 = vld [vmem:[%s1771_s1 + $0x18] sm:$0xff]   ;;  %v1396_v22 = vld [vmem:[%s1771_s1 + $0x10] sm:$0xff]  }
  0x12   : > { %1214 = vmatpush3.bf16.msra.mxu0 %v1380_v6  ;;  %v1389_v15 = vld [vmem:[%s1771_s1 + $0xa0] sm:$0xff]   ;;  %v1393_v19 = vld [vmem:[%s1771_s1 + $0x98] sm:$0xff]   ;;  %v1397_v23 = vld [vmem:[%s1771_s1 + $0x90] sm:$0xff]  }
  0x13   : > { %1254 = vmatpush3.bf16.msra.mxu1 %v1381_v7  ;;  %1215 = vmatprep.subr.bf16.mxu0 %v1382_v8  ;;  %v1398_v24 = vld [vmem:[%s1771_s1 + $0x48] sm:$0xff]   ;;  %v1402_v28 = vld [vmem:[%s1771_s1 + $0x40] sm:$0xff]   ;;  %v1412_v36 = vld [vmem:[%s1771_s1 + $0x178] sm:$0xff]  }
  0x14   : > { %1255 = vmatprep.subr.bf16.mxu1 %v1383_v9  ;;  %v1399_v25 = vld [vmem:[%s1771_s1 + $0xc8] sm:$0xff]   ;;  %v1403_v29 = vld [vmem:[%s1771_s1 + $0xc0] sm:$0xff]   ;;  %v1413_v37 = vld [vmem:[%s1771_s1 + $0x138] sm:$0xff]  }
  0x15   : > { %v1400_v26 = vld [vmem:[%s1771_s1 + $0x8] sm:$0xff]   ;;  %v1404_v30 = vld [vmem:[%s1771_s1] sm:$0xff]   ;;  %v1414_v38 = vld [vmem:[%s1771_s1 + $0x170] sm:$0xff]  }
  0x16   : > { %1216 = vmatpush3.bf16.msra.mxu0 %v1384_v10  ;;  %v1401_v27 = vld [vmem:[%s1771_s1 + $0x88] sm:$0xff]   ;;  %v1405_v31 = vld [vmem:[%s1771_s1 + $0x80] sm:$0xff]   ;;  %v1415_v39 = vld [vmem:[%s1771_s1 + $0x130] sm:$0xff]  }
  0x17   : > { %1256 = vmatpush3.bf16.msra.mxu1 %v1385_v11  ;;  %1217 = vmatprep.subr.bf16.mxu0 %v1386_v12  ;;  %v1406_v32 = vld [vmem:[%s1600_s27] ss:$28 sps:$4 sm:$0xff]   ;;  %v1409_v34 = vld [vmem:[%s1600_s27 + $0x8] ss:$28 sps:$4 sm:$0xff]   ;;  %v1420_v42 = vld [vmem:[%s1600_s27 + $0x38] ss:$28 sps:$4 sm:$0xff]  }
  0x18   : > { %1257 = vmatprep.subr.bf16.mxu1 %v1387_v13  ;;  %v1408_v33 = vld [vmem:[%s1600_s27 + $0x4] ss:$28 sps:$4 sm:$0xff]   ;;  %v1411_v35 = vld [vmem:[%s1600_s27 + $0xc] ss:$28 sps:$4 sm:$0xff]   ;;  %v1416_v40 = vld [vmem:[%s1600_s27 + $0x3c] ss:$28 sps:$4 sm:$0xff]  }
  0x19   : > { %794 = vmatprep.mubr.bf16.mxu0 %v1408_v33  ;;  %859 = vmatprep.mubr.bf16.mxu1 %v1411_v35  ;;  %v1418_v41 = vld [vmem:[%s1600_s27 + $0x44] ss:$28 sps:$4 sm:$0xff]   ;;  %v1422_v44 = vld [vmem:[%s1771_s1 + $0x168] sm:$0xff]   ;;  %v1426_v48 = vld [vmem:[%s1600_s27 + $0x74] ss:$28 sps:$4 sm:$0xff]   ;;  %v305_v35 = vlaneseq }
  0x1a   : > { %1218 = vmatpush3.bf16.msra.mxu0 %v1388_v14  ;;  %v1421_v43 = vld [vmem:[%s1600_s27 + $0x40] ss:$28 sps:$4 sm:$0xff]   ;;  %v1423_v45 = vld [vmem:[%s1771_s1 + $0x128] sm:$0xff]   ;;  %v1431_v52 = vld [vmem:[%s1600_s27 + $0x78] ss:$28 sps:$4 sm:$0xff]  }
  0x1b   : > { %1258 = vmatpush3.bf16.msra.mxu1 %v1389_v15  ;;  %1219 = vmatprep.subr.bf16.mxu0 %v1390_v16  ;;  %v1424_v46 = vld [vmem:[%s1771_s1 + $0x160] sm:$0xff]   ;;  %v1428_v49 = vld [vmem:[%s1600_s27 + $0x7c] ss:$28 sps:$4 sm:$0xff]   ;;  %v1430_v50 = vld [vmem:[%s1600_s27 + $0x70] ss:$28 sps:$4 sm:$0xff]  }
  0x1c   : > { %1259 = vmatprep.subr.bf16.mxu1 %v1391_v17  ;;  %v1425_v47 = vld [vmem:[%s1771_s1 + $0x120] sm:$0xff]   ;;  %v1432_v51 = vld [vmem:[%s1771_s1 + $0x158] sm:$0xff]   ;;  %v1434_v54 = vld [vmem:[%s1771_s1 + $0x150] sm:$0xff]  }
  0x1d   : > { %v1433_v53 = vld [vmem:[%s1771_s1 + $0x118] sm:$0xff]   ;;  %v1436_v55 = vld [vmem:[%s1600_s27 + $0xac] ss:$28 sps:$4 sm:$0xff]   ;;  %v1438_v56 = vld [vmem:[%s1600_s27 + $0xb4] ss:$28 sps:$4 sm:$0xff]  }
  0x1e   : > { %1220 = vmatpush3.bf16.msra.mxu0 %v1392_v18  ;;  %v1435_v57 = vld [vmem:[%s1771_s1 + $0x110] sm:$0xff]   ;;  %v1442_v58 = vld [vmem:[%s1771_s1 + $0x148] sm:$0xff]   ;;  %v1444_v62 = vld [vmem:[%s1771_s1 + $0x140] sm:$0xff]  }
  0x1f   : > { %1260 = vmatpush3.bf16.msra.mxu1 %v1393_v19  ;;  %1221 = vmatprep.subr.bf16.mxu0 %v1394_v20  ;;  %v1440_v59 = vld [vmem:[%s1600_s27 + $0xa8] ss:$28 sps:$4 sm:$0xff]   ;;  %v1441_v60 = vld [vmem:[%s1600_s27 + $0xb0] ss:$28 sps:$4 sm:$0xff]   ;;  %v1451_v0 = vld [vmem:[%s1600_s27 + $0xbc] ss:$28 sps:$4 sm:$0xff]  }
  0x20   : > { %1261 = vmatprep.subr.bf16.mxu1 %v1395_v21  ;;  %v1443_v61 = vld [vmem:[%s1771_s1 + $0x108] sm:$0xff]   ;;  %v1448_v63 = vld [vmem:[%s1600_s27 + $0x14] ss:$28 sps:$4 sm:$0xff]   ;;  %v1445_v1 = vld [vmem:[%s1771_s1 + $0x100] sm:$0xff]  }
  0x21   : > { %v1452_v2 = vld [vmem:[%s1771_s1 + $0x188] sm:$0xff]   ;;  %v1449_v4 = vld [vmem:[%s1600_s27 + $0xb8] ss:$28 sps:$4 sm:$0xff]   ;;  %v1453_v7 = vld [vmem:[%s1771_s1 + $0x180] sm:$0xff]  }
  0x22   : > { %1222 = vmatpush3.bf16.msra.mxu0 %v1396_v22  ;;  %v1446_v3 = vld [vmem:[%s1600_s27 + $0x10] ss:$28 sps:$4 sm:$0xff]   ;;  %v1456_v6 = vld [vmem:[%s1600_s27 + $0x18] ss:$28 sps:$4 sm:$0xff]   ;;  %v1457_v8 = vld [vmem:[%s1600_s27 + $0x48] ss:$28 sps:$4 sm:$0xff]  }
  0x23   : > { %1262 = vmatpush3.bf16.msra.mxu1 %v1397_v23  ;;  %1223 = vmatprep.subr.bf16.mxu0 %v1398_v24  ;;  %v1454_v5 = vld [vmem:[%s1600_s27 + $0x4c] ss:$28 sps:$4 sm:$0xff]   ;;  %v1459_v10 = vld [vmem:[%s1600_s27 + $0x84] ss:$28 sps:$4 sm:$0xff]  }
  0x24   : > { %1263 = vmatprep.subr.bf16.mxu1 %v1399_v25  ;;  %v1458_v9 = vld [vmem:[%s1600_s27 + $0x50] ss:$28 sps:$4 sm:$0xff]   ;;  %v1461_v11 = vld [vmem:[%s1600_s27 + $0x88] ss:$28 sps:$4 sm:$0xff]   ;;  %v1462_v12 = vld [vmem:[%s1600_s27 + $0x80] ss:$28 sps:$4 sm:$0xff]  }
  0x25   : > { %v1463_v13 = vld [vmem:[%s1600_s27 + $0xc0] ss:$28 sps:$4 sm:$0xff]  }
  0x26   : > { %1224 = vmatpush3.bf16.msra.mxu0 %v1400_v26 }
  0x27   : > { %1264 = vmatpush3.bf16.msra.mxu1 %v1401_v27  ;;  %1225 = vmatprep.subr.bf16.mxu0 %v1402_v28 }
  0x28   : > { %1265 = vmatprep.subr.bf16.mxu1 %v1403_v29 }
  0x2a   : > { %1226 = vmatpush3.bf16.msra.mxu0 %v1404_v30 }
  0x2b   : > { %1266 = vmatpush3.bf16.msra.mxu1 %v1405_v31  ;;  %1291 = vmatprep.subr.bf16.mxu0 %v1412_v36 }
  0x2c   : > { %1349 = vmatprep.subr.bf16.mxu1 %v1412_v36 }
  0x2d   : > { %795 = vmatmul.mubr.bf16.vlgmr.msra.gmra.mxu0 %v1406_v32 }
  0x2e   : > { %860 = vmatmul.mubr.bf16.vlgmr.msra.gmra.mxu1 %v1409_v34  ;;  %1292 = vmatpush3.bf16.msra.mxu0 %v1413_v37 }
  0x2f   : > { %1357 = vmatpush3.bf16.msra.mxu1 %v1413_v37  ;;  %1293 = vmatprep.subr.bf16.mxu0 %v1414_v38 }
  0x30   : > { %1350 = vmatprep.subr.bf16.mxu1 %v1414_v38  ;;  %802 = vmatprep.mubr.bf16.mxu0 %v1416_v40  ;;  %v306_v40 = vshrl.u32 %v305_v35, 7 }
  0x31   : > { %867 = vmatprep.mubr.bf16.mxu1 %v1418_v41 }
  0x32   : > { %1294 = vmatpush3.bf16.msra.mxu0 %v1415_v39 }
  0x33   : > { %1358 = vmatpush3.bf16.msra.mxu1 %v1415_v39  ;;  %1295 = vmatprep.subr.bf16.mxu0 %v1422_v44 }
  0x34   : > { %1351 = vmatprep.subr.bf16.mxu1 %v1422_v44 }
  0x35   : > { %803 = vmatmul.mubr.bf16.gmra.mxu0 %v1420_v42 }
  0x36   : > { %868 = vmatmul.mubr.bf16.gmra.mxu1 %v1421_v43  ;;  %1296 = vmatpush3.bf16.msra.mxu0 %v1423_v45 }
  0x37   : > { %1359 = vmatpush3.bf16.msra.mxu1 %v1423_v45  ;;  %1297 = vmatprep.subr.bf16.mxu0 %v1424_v46  ;;  %v307_v45 = vsub.s32 0, %v306_v40 }
  0x38   : > { %1352 = vmatprep.subr.bf16.mxu1 %v1424_v46  ;;  %810 = vmatprep.mubr.bf16.mxu0 %v1426_v48 }
  0x39   : > { %875 = vmatprep.mubr.bf16.mxu1 %v1428_v49 }
  0x3a   : > { %1298 = vmatpush3.bf16.msra.mxu0 %v1425_v47 }
  0x3b   : > { %1360 = vmatpush3.bf16.msra.mxu1 %v1425_v47  ;;  %1299 = vmatprep.subr.bf16.mxu0 %v1432_v51  ;;  %v304_v47 = vld [vmem:[%s1772_s2] sm:$0x7] }
  0x3c   : > { %1353 = vmatprep.subr.bf16.mxu1 %v1432_v51 }
  0x3d   : > { %811 = vmatmul.mubr.bf16.gmra.mxu0 %v1430_v50  ;;  %v1709_v50 = vrot.slane %v304_v47, %v307_v45 }
  0x3e   : > { %876 = vmatmul.mubr.bf16.gmra.mxu1 %v1431_v52  ;;  %1300 = vmatpush3.bf16.msra.mxu0 %v1433_v53 }
  0x3f   : > { %818 = vmatprep.mubr.bf16.mxu0 %v1436_v55  ;;  %1361 = vmatpush3.bf16.msra.mxu1 %v1433_v53 }
  0x40   : > { %1301 = vmatprep.subr.bf16.mxu0 %v1434_v54  ;;  %1354 = vmatprep.subr.bf16.mxu1 %v1434_v54 }
  0x41   : > { %883 = vmatprep.mubr.bf16.mxu1 %v1438_v56 }
  0x42   : > { %1302 = vmatpush3.bf16.msra.mxu0 %v1435_v57 }
  0x43   : > { %1362 = vmatpush3.bf16.msra.mxu1 %v1435_v57  ;;  %1303 = vmatprep.subr.bf16.mxu0 %v1442_v58 }
  0x44   : > { %1355 = vmatprep.subr.bf16.mxu1 %v1442_v58 }
  0x45   : > { %819 = vmatmul.mubr.bf16.gmra.mxu0 %v1440_v59 }
  0x46   : > { %884 = vmatmul.mubr.bf16.gmra.mxu1 %v1441_v60  ;;  %924 = vmatprep.mubr.bf16.mxu0 %v1448_v63 }
  0x47   : > { %1304 = vmatpush3.bf16.msra.mxu0 %v1443_v61  ;;  %1363 = vmatpush3.bf16.msra.mxu1 %v1443_v61 }
  0x48   : > { %1305 = vmatprep.subr.bf16.mxu0 %v1444_v62  ;;  %1356 = vmatprep.subr.bf16.mxu1 %v1444_v62 }
  0x49   : > { %948 = vmatprep.mubr.bf16.mxu1 %v1451_v0 }
  0x4b   : > { %1306 = vmatpush3.bf16.msra.mxu0 %v1445_v1  ;;  %1364 = vmatpush3.bf16.msra.mxu1 %v1445_v1 }
  0x4c   : > { %1337 = vmatprep.subr.bf16.mxu1 %v1452_v2 }
  0x4e   : > { %925 = vmatmul.mubr.bf16.vlgmr.msra.gmra.mxu0 %v1446_v3  ;;  %949 = vmatmul.mubr.bf16.vlgmr.msra.gmra.mxu1 %v1449_v4 }
  0x4f   : > { %932 = vmatprep.mubr.bf16.mxu0 %v1454_v5  ;;  %1338 = vmatpush3.bf16.msra.mxu1 %v1452_v2  ;;  %v1044_v2 = vsub.s32 2, %v306_v40 }
  0x50   : > { %1341 = vmatprep.mubr.msk.bf16.mxu1 %vm749_vm0, %v1456_v6  ;;  %1339 = vmatprep.subr.bf16.mxu1 %v1453_v7 }
  0x53   : > { %1340 = vmatpush3.bf16.msra.mxu1 %v1453_v7 }
  0x56   : > { %933 = vmatmul.mubr.bf16.gmra.mxu0 %v1457_v8  ;;  %1342 = vmatmul.mubr.msk.bf16.vlgmr.msra.gmra.mxu1 %vm749_vm0, %v1458_v9  ;;  %v1032_v9 = vsub.s32 1, %v306_v40 }
  0x57   : > { %940 = vmatprep.mubr.bf16.mxu0 %v1459_v10  ;;  %1345 = vmatprep.mubr.msk.bf16.mxu1 %vm749_vm0, %v1461_v11 }
  0x5e   : > { %941 = vmatmul.mubr.bf16.gmra.mxu0 %v1462_v12  ;;  %1346 = vmatmul.mubr.msk.bf16.gmra.mxu1 %vm749_vm0, %v1463_v13 }
  0xed   : > { %v1227_v14 = vpop.f32.mrf.mxu0 }
  0xee   : > { %v1267_v15 = vpop.f32.mrf.mxu1 }
  0xef   : > { %v1228_v16 = vpop.f32.mrf.mxu0 }
  0xf0   : > { %v1268_v17 = vpop.f32.mrf.mxu1  ;;  %v1229_v51 = vadd.f32 %v1228_v16, %v1227_v14 }
  0xf1   : > { %v1230_v18 = vpop.f32.mrf.mxu0  ;;  %v1269_v58 = vadd.f32 %v1268_v17, %v1267_v15 }
  0xf2   : > { %v1270_v19 = vpop.f32.mrf.mxu1  ;;  %v797_v57 = vadd.f32 %v1229_v51, %v1709_v50 }
  0xf3   : > { %v1231_v20 = vpop.f32.mrf.mxu0 }
  0xf4   : > { %v1271_v21 = vpop.f32.mrf.mxu1  ;;  %v1232_v59 = vadd.f32 %v1231_v20, %v1230_v18  ;;  %v862_v6 = vadd.f32 %v1269_v58, %v797_v57 }
  0xf5   : > { %v1233_v22 = vpop.f32.mrf.mxu0  ;;  %v1272_v10 = vadd.f32 %v1271_v21, %v1270_v19  ;;  %v1718_v21 = vrot.slane %v304_v47, %v1032_v9 }
  0xf6   : > { %v1273_v23 = vpop.f32.mrf.mxu1  ;;  %v800_v7 = vadd.f32 %v1232_v59, %v1709_v50 }
  0xf7   : > { %v1234_v24 = vpop.f32.mrf.mxu0 }
  0xf8   : > { %v1274_v25 = vpop.f32.mrf.mxu1  ;;  %v1235_v55 = vadd.f32 %v1234_v24, %v1233_v22  ;;  %v1716_v22 = vrot.slane %v304_v47, %v1044_v2 }
  0xf9   : > { %v1236_v26 = vpop.f32.mrf.mxu0  ;;  %v1275_v4 = vadd.f32 %v1274_v25, %v1273_v23 }
  0xfa   : > { %v1276_v27 = vpop.f32.mrf.mxu1  ;;  %v805_v3 = vadd.f32 %v1235_v55, %v1709_v50 }
  0xfb   : > { %v1237_v28 = vpop.f32.mrf.mxu0 }
  0xfc   : > { %v1277_v29 = vpop.f32.mrf.mxu1  ;;  %v1238_v61 = vadd.f32 %v1237_v28, %v1236_v26  ;;  %v870_v23 = vadd.f32 %v1275_v4, %v805_v3  ;;  %v865_v28 = vadd.f32 %v1272_v10, %v800_v7 }
  0xfd   : > { %v1239_v30 = vpop.f32.mrf.mxu0  ;;  %v1278_v24 = vadd.f32 %v1277_v29, %v1276_v27 }
  0xfe   : > { %v1694_v31 = vpop.f32.mrf.mxu1  ;;  %v808_v11 = vadd.f32 %v1238_v61, %v1709_v50 }
  0xff   : > { %v1240_v32 = vpop.f32.mrf.mxu0 }
 0x100   : > { %v1696_v33 = vpop.f32.mrf.mxu1  ;;  %v1241_v12 = vadd.f32 %v1240_v32, %v1239_v30  ;;  %v873_v35 = vadd.f32 %v1278_v24, %v808_v11 }
 0x101   : > { %v1698_v34 = vpop.f32.mrf.mxu0  ;;  %v1281_v40 = vadd.f32 %v1696_v33, %v1694_v31 }
 0x102   : > { %v1700_v36 = vpop.f32.mrf.mxu1 }
 0x103   : > { %v1702_v37 = vpop.f32.mrf.mxu0 }
 0x104   : > { %v1704_v38 = vpop.f32.mrf.mxu1  ;;  %v1244_v47 = vadd.f32 %v1702_v37, %v1698_v34 }
 0x105   : > { %v1245_v39 = vpop.f32.mrf.mxu0  ;;  %v1284_v7 = vadd.f32 %v1704_v38, %v1700_v36 }
 0x106   : > { %v1285_v41 = vpop.f32.mrf.mxu1 }
 0x107   : > { %v1246_v42 = vpop.f32.mrf.mxu0 }
 0x108   : > { %v1286_v43 = vpop.f32.mrf.mxu1  ;;  %v1247_v63 = vadd.f32 %v1246_v42, %v1245_v39  ;;  %v813_v39 = vadd.f32 %v1241_v12, %v1709_v50 }
 0x109   : > { %v1248_v44 = vpop.f32.mrf.mxu0  ;;  %v1287_v13 = vadd.f32 %v1286_v43, %v1285_v41 }
 0x10a   : > { %v1288_v46 = vpop.f32.mrf.mxu1  ;;  %v821_v15 = vadd.f32 %v1247_v63, %v1709_v50  ;;  %v878_v57 = vadd.f32 %v1281_v40, %v813_v39 }
 0x10b   : > { %v1249_v48 = vpop.f32.mrf.mxu0 }
 0x10c   : > { %v1289_v49 = vpop.f32.mrf.mxu1  ;;  %v1250_v16 = vadd.f32 %v1249_v48, %v1248_v44  ;;  %v886_v43 = vadd.f32 %v1287_v13, %v821_v15 }
 0x10d   : > { %v1290_v48 = vadd.f32 %v1289_v49, %v1288_v46 }
 0x10e   : > { %v1307_v52 = vpop.f32.mrf.mxu0  ;;  %v1325_v53 = vpop.f32.mrf.mxu1  ;;  %v824_v44 = vadd.f32 %v1250_v16, %v1709_v50 }
 0x110   : > { %v1308_v54 = vpop.f32.mrf.mxu0  ;;  %v1326_v56 = vpop.f32.mrf.mxu1  ;;  %v889_v46 = vadd.f32 %v1290_v48, %v824_v44 }
 0x111   : > { %v1309_v0 = vadd.f32 %v1308_v54, %v1307_v52  ;;  %v1327_v19 = vadd.f32 %v1326_v56, %v1325_v53 }
 0x112   : > { %v1310_v60 = vpop.f32.mrf.mxu0  ;;  %v1328_v62 = vpop.f32.mrf.mxu1 }
 0x113   : > { %v927_v20 = vadd.f32 %v1309_v0, %v862_v6  ;;  %v951_v56 = vadd.f32 %v1327_v19, %v886_v43 }
 0x114   : > { %v1311_v1 = vpop.f32.mrf.mxu0  ;;  %v1329_v5 = vpop.f32.mrf.mxu1 }
 0x115   : > { %v1312_v17 = vadd.f32 %v1311_v1, %v1310_v60  ;;  %v1330_v54 = vadd.f32 %v1329_v5, %v1328_v62  ;;  %v816_v62 = vadd.f32 %v1244_v47, %v1709_v50 }
 0x116   : > { %v1313_v8 = vpop.f32.mrf.mxu0  ;;  %v1343_v14 = vpop.f32.mrf.mxu1 }
 0x117   : > { %v930_v45 = vadd.f32 %v1312_v17, %v865_v28  ;;  %v954_v6 = vadd.f32 %v1330_v54, %v889_v46  ;;  %v881_v15 = vadd.f32 %v1284_v7, %v816_v62 }
 0x118   : > { %v1314_v18 = vpop.f32.mrf.mxu0  ;;  %v991_v26 = vpop.f32.mrf.mxu1 }
 0x119   : > { %v1315_v25 = vadd.f32 %v1314_v18, %v1313_v8  ;;  %v992_v30 = vadd.f32 %v991_v26, %v927_v20 }
 0x11a   : > { %v1316_v32 = vpop.f32.mrf.mxu0  ;;  %v1344_v42 = vpop.f32.mrf.mxu1 }
 0x11b   : > { %v935_v41 = vadd.f32 %v1315_v25, %v870_v23  ;;  %v1022_v27 = vmax.f32 %v992_v30, 0.0 }
 0x11c   : > { %v1317_v29 = vpop.f32.mrf.mxu0  ;;  %v994_v53 = vpop.f32.mrf.mxu1 }
 0x11d   : > { %v1000_v51 = vadd.f32 %v1343_v14, %v935_v41  ;;  %v1318_v52 = vadd.f32 %v1317_v29, %v1316_v32  ;;  %v1034_v55 = vmul.f32 %v1718_v21, %v1022_v27  ;;  %v995_v31 = vadd.f32 %v994_v53, %v930_v45 }
 0x11e   : > { %v1319_v33 = vpop.f32.mrf.mxu0  ;;  %v1347_v37 = vpop.f32.mrf.mxu1 }
 0x11f   : > { %v1024_v58 = vmax.f32 %v1000_v51, 0.0  ;;  %v938_v34 = vadd.f32 %v1318_v52, %v873_v35  ;;  %v1046_v49 = vadd.f32 %v1716_v22, %v1034_v55  ;;  %v1023_v59 = vmax.f32 %v995_v31, 0.0 }
 0x120   : > { %v1016_v60 = vadd.f32 %v1347_v37, %v951_v56  ;;  %v1320_v61 = vpop.f32.mrf.mxu0  ;;  %v1007_v2 = vpop.f32.mrf.mxu1 }
 0x121   : > { %v1036_v63 = vmul.f32 %v1718_v21, %v1024_v58  ;;  %v1003_v0 = vadd.f32 %v1344_v42, %v938_v34  ;;  %v1321_v1 = vadd.f32 %v1320_v61, %v1319_v33  ;;  %1055 = vst.msk [vmem:[%s1731_s13] sm:$0xff] %vm1054_vm1, %v1046_v49  ;;  %v1035_v3 = vmul.f32 %v1718_v21, %v1023_v59 }
 0x122   : > { %v1028_v4 = vmax.f32 %v1016_v60, 0.0  ;;  %v1322_v5 = vpop.f32.mrf.mxu0  ;;  %v1348_v10 = vpop.f32.mrf.mxu1 }
 0x123   : > { %v1048_v8 = vadd.f32 %v1716_v22, %v1036_v63  ;;  %v1025_v50 = vmax.f32 %v1003_v0, 0.0  ;;  %v943_v9 = vadd.f32 %v1321_v1, %v878_v57  ;;  %v1047_v11 = vadd.f32 %v1716_v22, %v1035_v3 }
 0x124   : > { %v1040_v12 = vmul.f32 %v1718_v21, %v1028_v4  ;;  %v1019_v13 = vadd.f32 %v1348_v10, %v954_v6  ;;  %v1323_v14 = vpop.f32.mrf.mxu0  ;;  %v1010_v26 = vpop.f32.mrf.mxu1 }
 0x125   : > { %1057 = vst.msk [vmem:[%s1731_s13 + $0x10] sm:$0xff] %vm1054_vm1, %v1048_v8  ;;  %v1037_v16 = vmul.f32 %v1718_v21, %v1025_v50  ;;  %v1008_v17 = vadd.f32 %v1007_v2, %v943_v9  ;;  %v1324_v36 = vadd.f32 %v1323_v14, %v1322_v5  ;;  %1056 = vst.msk [vmem:[%s1731_s13 + $0x8] sm:$0xff] %vm1054_vm1, %v1047_v11 }
 0x126   : > { %v1052_v38 = vadd.f32 %v1716_v22, %v1040_v12  ;;  %v1029_v18 = vmax.f32 %v1019_v13, 0.0 }
 0x127   : > { %v1049_v20 = vadd.f32 %v1716_v22, %v1037_v16  ;;  %v1026_v23 = vmax.f32 %v1008_v17, 0.0  ;;  %v946_v24 = vadd.f32 %v1324_v36, %v881_v15 }
 0x128   : > { %1061 = vst.msk [vmem:[%s1731_s13 + $0x30] sm:$0xff] %vm1054_vm1, %v1052_v38  ;;  %v1041_v25 = vmul.f32 %v1718_v21, %v1029_v18 }
 0x129   : > { %1058 = vst.msk [vmem:[%s1731_s13 + $0x18] sm:$0xff] %vm1054_vm1, %v1049_v20  ;;  %v1038_v28 = vmul.f32 %v1718_v21, %v1026_v23  ;;  %v1011_v19 = vadd.f32 %v1010_v26, %v946_v24 }
 0x12a   : > { %v1053_v30 = vadd.f32 %v1716_v22, %v1041_v25 }
 0x12b   : > { %v1050_v32 = vadd.f32 %v1716_v22, %v1038_v28  ;;  %v1027_v35 = vmax.f32 %v1011_v19, 0.0 }
 0x12c   : > { %1062 = vst.msk [vmem:[%s1731_s13 + $0x38] sm:$0xff] %vm1054_vm1, %v1053_v30 }
 0x12d   : > { %1059 = vst.msk [vmem:[%s1731_s13 + $0x20] sm:$0xff] %vm1054_vm1, %v1050_v32  ;;  %v1039_v39 = vmul.f32 %v1718_v21, %v1027_v35 }
 0x12f   : > { %v1051_v40 = vadd.f32 %v1716_v22, %v1039_v39 }
 0x131   : > { %1060 = vst.msk [vmem:[%s1731_s13 + $0x28] sm:$0xff] %vm1054_vm1, %v1051_v40 }
 0x132 PF: > { %s13_s12 = sadd.s32 1, %s1470_s12  }
 0x133   : > { %p10_p4 = scmp.ge.s32.totalorder %s13_s12, 4  }
 0x135   :  { %12 = sbr.rel (!%p10_p4) target bundleno = 1 (0x1), region = 62 }

// kernel: cnn_forward.5
= control target key start
LH: loop header
LB: loop body
LE: loop exit
PB: predicated region body
PF: predicated region fallthrough
CT: control target
= control target key end

     0   :  { %10 = vsyncpa [#allocation4], 0  ;;  %s3646_s18 = smov 0   ;;  %s4211_s0 = inlined_call_operand.vmem [shape: bf16[2,1024], index: 0, kind: input, shape index: {}]   ;;  %s4212_s1 = inlined_call_operand.vmem [shape: bf16[1024,1024], index: 1, kind: input, shape index: {}]   ;;  %s4213_s2 = inlined_call_operand.vmem [shape: f32[1,1024], index: 2, kind: input, shape index: {}]   ;;  %s4214_s3 = inlined_call_operand.vmem [shape: bf16[1024,2], index: 3, kind: input, shape index: {}]   ;;  %s4215_s4 = inlined_call_operand.vmem [shape: f32[1,2], index: 4, kind: input, shape index: {}]   ;;  %s4216_s5 = inlined_call_operand.hbm [shape: f32[2,2], index: 5, kind: output, shape index: {}]  }
   0x1 LB: > { %s3652_s19 = sadd.s32 4294967295, %s3610_s18   ;;  %p3068_p0 = scmp.ge.s32.totalorder %s3610_s18, 1  ;;  %s3610_s18 = sphi %s3646_s18, %s16_s18  }
   0x2   : > { %p195_p1 = scmp.lt.s32.totalorder %s3610_s18, 3 }
   0x4   : > { %p196_p2 = pnand %p3068_p0, %p195_p1 }
   0x5   : > { %s3069_s20 = sshll.u32 (!%p196_p2), %s3652_s19, 2  ;;  %s3070_s21 = sshll.u32 (!%p196_p2), %s3652_s19, 6 }
   0x6   : > { %199 = sbr.rel (%p196_p2) target bundleno = 1084 (0x43c), region = 40  ;;  %p224_p3 = scmp.lt.s32.totalorder (!%p196_p2), %s3069_s20, 7 }
   0x7   : > { %p229_p4 = scmp.lt.s32.totalorder (!%p196_p2), %s3070_s21, 127  ;;  %p3073_p5 = scmp.ne.s32.totalorder (!%p196_p2), %s3652_s19, 0 }
   0xb   : > { %s4218_s20 = smov (!%p224_p3, %s3069_s20), 7  ;;  %s4220_s21 = smov (!%p229_p4, %s3070_s21), 127 }
   0xc   : > { %s226_s24 = scalar_lea.vmem %s4211_s0, %s4218_s20  ;;  %s3401_s25 = sshll.u32 %s4220_s21, 5 }
   0xd   : > { %s3667_s28 = scalar_lea.vmem %s4212_s1, %s3401_s25  ;;  %239 = sbr.rel (%p3073_p5) target bundleno = 20 (0x14), region = 44 }
  0x12   : > { %v3612_v0 = vmov 0.0  }
  0x13   : > { %240 = vst [vmem:[#allocation2] sm:$0xff] %v3612_v0  ;;  %241 = vst [vmem:[#allocation2 + $0x8] sm:$0xff] %v3612_v0 }
  0x14 PF: > { %v301_v1 = vld [vmem:[%s3667_s28 + $0x1c0] sm:$0xff]  ;;  %v3613_v36 = vmov 1966171168   ;;  %v513_v38 = vlaneseq  ;;  %p3331_p6 = scmp.ne.s32.totalorder %s3652_s19, 1 }
  0x15   : > { %v305_v2 = vld [vmem:[%s3667_s28 + $0x1e0] sm:$0xff]  ;;  %v511_v37 = vunpack.c.l.s4 %v3613_v36 }
  0x16   : > { %v429_v3 = vld [vmem:[%s3667_s28 + $0x5c0] sm:$0xff]  ;;  %v3132_v4 = vcombine.high %v301_v1, %v305_v2  ;;  %v3131_v6 = vcombine.low %v301_v1, %v305_v2  ;;  %v3694_v48 = vshrl.u32 %v513_v38, 7 }
  0x17   : > { %v433_v5 = vld [vmem:[%s3667_s28 + $0x5e0] sm:$0xff]  ;;  %v512_v47 = vunpack.c.0.s8 %v511_v37 }
  0x18   : > { %v293_v7 = vld [vmem:[%s3667_s28 + $0x180] sm:$0xff]  ;;  %v3260_v9 = vcombine.high %v429_v3, %v433_v5  ;;  %v3259_v10 = vcombine.low %v429_v3, %v433_v5  ;;  %1810 = vmatprep.subr.bf16.mxu0 %v3132_v4 }
  0x19   : > { %v297_v8 = vld [vmem:[%s3667_s28 + $0x1a0] sm:$0xff]  ;;  %1811 = vmatpush1.bf16.msra.mxu0 %v3131_v6  ;;  %v3701_v57 = vsub.s32 %v512_v47, %v3694_v48 }
  0x1a   : > { %v3124_v11 = vcombine.high %v293_v7, %v297_v8  ;;  %v421_v12 = vld [vmem:[%s3667_s28 + $0x580] sm:$0xff]  ;;  %1851 = vmatprep.subr.bf16.mxu1 %v3260_v9  ;;  %v3123_v19 = vcombine.low %v293_v7, %v297_v8 }
  0x1b   : > { %v425_v13 = vld [vmem:[%s3667_s28 + $0x5a0] sm:$0xff]  ;;  %1852 = vmatpush1.bf16.msra.mxu1 %v3259_v10 }
  0x1c   : > { %v285_v14 = vld [vmem:[%s3667_s28 + $0x140] sm:$0xff]  ;;  %v3252_v15 = vcombine.high %v421_v12, %v425_v13  ;;  %1812 = vmatprep.subr.bf16.mxu0 %v3124_v11  ;;  %v3251_v20 = vcombine.low %v421_v12, %v425_v13 }
  0x1d   : > { %v289_v16 = vld [vmem:[%s3667_s28 + $0x160] sm:$0xff]  ;;  %1813 = vmatpush1.bf16.msra.mxu0 %v3123_v19 }
  0x1e   : > { %v413_v17 = vld [vmem:[%s3667_s28 + $0x540] sm:$0xff]  ;;  %v3116_v21 = vcombine.high %v285_v14, %v289_v16  ;;  %1853 = vmatprep.subr.bf16.mxu1 %v3252_v15  ;;  %v3115_v27 = vcombine.low %v285_v14, %v289_v16 }
  0x1f   : > { %v417_v18 = vld [vmem:[%s3667_s28 + $0x560] sm:$0xff]  ;;  %1854 = vmatpush1.bf16.msra.mxu1 %v3251_v20 }
  0x20   : > { %v3244_v22 = vcombine.high %v413_v17, %v417_v18  ;;  %v277_v23 = vld [vmem:[%s3667_s28 + $0x100] sm:$0xff]  ;;  %1814 = vmatprep.subr.bf16.mxu0 %v3116_v21  ;;  %v3243_v28 = vcombine.low %v413_v17, %v417_v18 }
  0x21   : > { %v281_v24 = vld [vmem:[%s3667_s28 + $0x120] sm:$0xff]  ;;  %1815 = vmatpush1.bf16.msra.mxu0 %v3115_v27 }
  0x22   : > { %v405_v25 = vld [vmem:[%s3667_s28 + $0x500] sm:$0xff]  ;;  %v3108_v29 = vcombine.high %v277_v23, %v281_v24  ;;  %1855 = vmatprep.subr.bf16.mxu1 %v3244_v22  ;;  %v3107_v35 = vcombine.low %v277_v23, %v281_v24 }
  0x23   : > { %v409_v26 = vld [vmem:[%s3667_s28 + $0x520] sm:$0xff]  ;;  %1856 = vmatpush1.bf16.msra.mxu1 %v3243_v28 }
  0x24   : > { %v3236_v30 = vcombine.high %v405_v25, %v409_v26  ;;  %v269_v31 = vld [vmem:[%s3667_s28 + $0xc0] sm:$0xff]  ;;  %1816 = vmatprep.subr.bf16.mxu0 %v3108_v29  ;;  %v3235_v39 = vcombine.low %v405_v25, %v409_v26 }
  0x25   : > { %v273_v32 = vld [vmem:[%s3667_s28 + $0xe0] sm:$0xff]  ;;  %1817 = vmatpush1.bf16.msra.mxu0 %v3107_v35 }
  0x26   : > { %v397_v33 = vld [vmem:[%s3667_s28 + $0x4c0] sm:$0xff]  ;;  %v3100_v40 = vcombine.high %v269_v31, %v273_v32  ;;  %1857 = vmatprep.subr.bf16.mxu1 %v3236_v30  ;;  %v3099_v46 = vcombine.low %v269_v31, %v273_v32 }
  0x27   : > { %v401_v34 = vld [vmem:[%s3667_s28 + $0x4e0] sm:$0xff]  ;;  %1858 = vmatpush1.bf16.msra.mxu1 %v3235_v39 }
  0x28   : > { %v3228_v41 = vcombine.high %v397_v33, %v401_v34  ;;  %v261_v42 = vld [vmem:[%s3667_s28 + $0x80] sm:$0xff]  ;;  %1818 = vmatprep.subr.bf16.mxu0 %v3100_v40  ;;  %v3227_v49 = vcombine.low %v397_v33, %v401_v34 }
  0x29   : > { %v265_v43 = vld [vmem:[%s3667_s28 + $0xa0] sm:$0xff]  ;;  %1819 = vmatpush1.bf16.msra.mxu0 %v3099_v46 }
  0x2a   : > { %v389_v44 = vld [vmem:[%s3667_s28 + $0x480] sm:$0xff]  ;;  %v3092_v50 = vcombine.high %v261_v42, %v265_v43  ;;  %1859 = vmatprep.subr.bf16.mxu1 %v3228_v41  ;;  %v3091_v56 = vcombine.low %v261_v42, %v265_v43 }
  0x2b   : > { %v393_v45 = vld [vmem:[%s3667_s28 + $0x4a0] sm:$0xff]  ;;  %1860 = vmatpush1.bf16.msra.mxu1 %v3227_v49 }
  0x2c   : > { %v3220_v51 = vcombine.high %v389_v44, %v393_v45  ;;  %v253_v52 = vld [vmem:[%s3667_s28 + $0x40] sm:$0xff]  ;;  %1820 = vmatprep.subr.bf16.mxu0 %v3092_v50  ;;  %v3219_v58 = vcombine.low %v389_v44, %v393_v45 }
  0x2d   : > { %v257_v53 = vld [vmem:[%s3667_s28 + $0x60] sm:$0xff]  ;;  %1821 = vmatpush1.bf16.msra.mxu0 %v3091_v56 }
  0x2e   : > { %v381_v54 = vld [vmem:[%s3667_s28 + $0x440] sm:$0xff]  ;;  %v3084_v59 = vcombine.high %v253_v52, %v257_v53  ;;  %1861 = vmatprep.subr.bf16.mxu1 %v3220_v51  ;;  %v3083_v3 = vcombine.low %v253_v52, %v257_v53 }
  0x2f   : > { %v385_v55 = vld [vmem:[%s3667_s28 + $0x460] sm:$0xff]  ;;  %1862 = vmatpush1.bf16.msra.mxu1 %v3219_v58 }
  0x30   : > { %v3708_v60 = vld.sshfl [vmem:[%s226_s24] sm:$0x33 pattern:$0x75316420]  ;;  %v3212_v61 = vcombine.high %v381_v54, %v385_v55  ;;  %1822 = vmatprep.subr.bf16.mxu0 %v3084_v59  ;;  %v3211_v5 = vcombine.low %v381_v54, %v385_v55 }
  0x31   : > { %v245_v62 = vld [vmem:[%s3667_s28] sm:$0xff]  ;;  %v509_v0 = vcombine.high %v3708_v60, %v3708_v60  ;;  %1823 = vmatpush1.bf16.msra.mxu0 %v3083_v3 }
  0x32   : > { %v249_v63 = vld [vmem:[%s3667_s28 + $0x20] sm:$0xff]  ;;  %1863 = vmatprep.subr.bf16.mxu1 %v3212_v61 }
  0x33   : > { %v373_v1 = vld [vmem:[%s3667_s28 + $0x400] sm:$0xff]  ;;  %v3717_v4 = vrot.slane %v509_v0, %v3701_v57  ;;  %v3076_v6 = vcombine.high %v245_v62, %v249_v63  ;;  %v3075_v13 = vcombine.low %v245_v62, %v249_v63  ;;  %1864 = vmatpush1.bf16.msra.mxu1 %v3211_v5 }
  0x34   : > { %v377_v2 = vld [vmem:[%s3667_s28 + $0x420] sm:$0xff] }
  0x35   : > { %v3204_v7 = vcombine.high %v373_v1, %v377_v2  ;;  %v365_v8 = vld [vmem:[%s3667_s28 + $0x3c0] sm:$0xff]  ;;  %1842 = vmatprep.mubr.bf16.mxu0 %v3717_v4  ;;  %v3724_v10 = vcombine.high %v3717_v4, %v3717_v4  ;;  %1824 = vmatprep.subr.bf16.mxu0 %v3076_v6  ;;  %v3203_v14 = vcombine.low %v373_v1, %v377_v2 }
  0x36   : > { %v369_v9 = vld [vmem:[%s3667_s28 + $0x3e0] sm:$0xff]  ;;  %1825 = vmatpush1.bf16.msra.mxu0 %v3075_v13 }
  0x37   : > { %v493_v11 = vld [vmem:[%s3667_s28 + $0x7c0] sm:$0xff]  ;;  %1883 = vmatprep.mubr.bf16.mxu1 %v3724_v10  ;;  %v3196_v15 = vcombine.high %v365_v8, %v369_v9  ;;  %1865 = vmatprep.subr.bf16.mxu1 %v3204_v7  ;;  %v3195_v21 = vcombine.low %v365_v8, %v369_v9 }
  0x38   : > { %v497_v12 = vld [vmem:[%s3667_s28 + $0x7e0] sm:$0xff]  ;;  %1866 = vmatpush1.bf16.msra.mxu1 %v3203_v14  ;;  %v302_v14 = vld [vmem:[%s3667_s28 + $0x1c8] sm:$0xff] }
  0x39   : > { %v3324_v16 = vcombine.high %v493_v11, %v497_v12  ;;  %v357_v17 = vld [vmem:[%s3667_s28 + $0x380] sm:$0xff]  ;;  %1826 = vmatprep.subr.bf16.mxu0 %v3196_v15  ;;  %v3323_v22 = vcombine.low %v493_v11, %v497_v12  ;;  %v306_v15 = vld [vmem:[%s3667_s28 + $0x1e8] sm:$0xff] }
  0x3a   : > { %v361_v18 = vld [vmem:[%s3667_s28 + $0x3a0] sm:$0xff]  ;;  %1827 = vmatpush2.bf16.msra.mxu0 %v3195_v21  ;;  %v3134_v21 = vcombine.high %v302_v14, %v306_v15 }
  0x3b   : > { %v485_v19 = vld [vmem:[%s3667_s28 + $0x780] sm:$0xff]  ;;  %v3188_v23 = vcombine.high %v357_v17, %v361_v18  ;;  %1867 = vmatprep.subr.bf16.mxu1 %v3324_v16  ;;  %v3187_v29 = vcombine.low %v357_v17, %v361_v18  ;;  %v430_v16 = vld [vmem:[%s3667_s28 + $0x5c8] sm:$0xff] }
  0x3c   : > { %v489_v20 = vld [vmem:[%s3667_s28 + $0x7a0] sm:$0xff]  ;;  %1868 = vmatpush2.bf16.msra.mxu1 %v3323_v22  ;;  %v434_v17 = vld [vmem:[%s3667_s28 + $0x5e8] sm:$0xff] }
  0x3d   : > { %v3316_v24 = vcombine.high %v485_v19, %v489_v20  ;;  %v349_v25 = vld [vmem:[%s3667_s28 + $0x340] sm:$0xff]  ;;  %1828 = vmatprep.subr.bf16.mxu0 %v3188_v23  ;;  %v3315_v30 = vcombine.low %v485_v19, %v489_v20  ;;  %v3763_v19 = vrot.slane %v3708_v60, %v3701_v57  ;;  %v3262_v22 = vcombine.high %v430_v16, %v434_v17  ;;  %v294_v23 = vld [vmem:[%s3667_s28 + $0x188] sm:$0xff] }
  0x3e   : > { %v353_v26 = vld [vmem:[%s3667_s28 + $0x360] sm:$0xff]  ;;  %1829 = vmatpush2.bf16.msra.mxu0 %v3187_v29  ;;  %v3133_v57 = vcombine.low %v302_v14, %v306_v15  ;;  %v3261_v60 = vcombine.low %v430_v16, %v434_v17  ;;  %v378_v14 = vld [vmem:[%s3667_s28 + $0x428] sm:$0xff] }
  0x3f   : > { %v477_v27 = vld [vmem:[%s3667_s28 + $0x740] sm:$0xff]  ;;  %v3180_v31 = vcombine.high %v349_v25, %v353_v26  ;;  %1869 = vmatprep.subr.bf16.mxu1 %v3316_v24  ;;  %v3179_v37 = vcombine.low %v349_v25, %v353_v26  ;;  %v298_v24 = vld [vmem:[%s3667_s28 + $0x1a8] sm:$0xff] }
  0x40   : > { %v481_v28 = vld [vmem:[%s3667_s28 + $0x760] sm:$0xff]  ;;  %1870 = vmatpush2.bf16.msra.mxu1 %v3315_v30  ;;  %v422_v25 = vld [vmem:[%s3667_s28 + $0x588] sm:$0xff] }
  0x41   : > { %v3308_v32 = vcombine.high %v477_v27, %v481_v28  ;;  %v341_v33 = vld [vmem:[%s3667_s28 + $0x300] sm:$0xff]  ;;  %1830 = vmatprep.subr.bf16.mxu0 %v3180_v31  ;;  %v3307_v38 = vcombine.low %v477_v27, %v481_v28  ;;  %v426_v26 = vld [vmem:[%s3667_s28 + $0x5a8] sm:$0xff]  ;;  %v3771_v27 = vcombine.high %v3763_v19, %v3763_v19  ;;  %v3126_v28 = vcombine.high %v294_v23, %v298_v24 }
  0x42   : > { %v345_v34 = vld [vmem:[%s3667_s28 + $0x320] sm:$0xff]  ;;  %1831 = vmatpush2.bf16.msra.mxu0 %v3179_v37  ;;  %v3254_v29 = vcombine.high %v422_v25, %v426_v26  ;;  %v286_v30 = vld [vmem:[%s3667_s28 + $0x148] sm:$0xff] }
  0x43   : > { %v469_v35 = vld [vmem:[%s3667_s28 + $0x700] sm:$0xff]  ;;  %v3172_v39 = vcombine.high %v341_v33, %v345_v34  ;;  %1871 = vmatprep.subr.bf16.mxu1 %v3308_v32  ;;  %v3171_v45 = vcombine.low %v341_v33, %v345_v34  ;;  %v290_v31 = vld [vmem:[%s3667_s28 + $0x168] sm:$0xff]  ;;  %v3125_v34 = vcombine.low %v294_v23, %v298_v24 }
  0x44   : > { %v473_v36 = vld [vmem:[%s3667_s28 + $0x720] sm:$0xff]  ;;  %1872 = vmatpush2.bf16.msra.mxu1 %v3307_v38  ;;  %v414_v32 = vld [vmem:[%s3667_s28 + $0x548] sm:$0xff] }
  0x45   : > { %v3300_v40 = vcombine.high %v469_v35, %v473_v36  ;;  %v333_v41 = vld [vmem:[%s3667_s28 + $0x2c0] sm:$0xff]  ;;  %1832 = vmatprep.subr.bf16.mxu0 %v3172_v39  ;;  %v3299_v46 = vcombine.low %v469_v35, %v473_v36  ;;  %v418_v33 = vld [vmem:[%s3667_s28 + $0x568] sm:$0xff]  ;;  %v3253_v35 = vcombine.low %v422_v25, %v426_v26  ;;  %v3118_v36 = vcombine.high %v286_v30, %v290_v31 }
  0x46   : > { %v337_v42 = vld [vmem:[%s3667_s28 + $0x2e0] sm:$0xff]  ;;  %1833 = vmatpush2.bf16.msra.mxu0 %v3171_v45  ;;  %v3246_v37 = vcombine.high %v414_v32, %v418_v33  ;;  %v278_v38 = vld [vmem:[%s3667_s28 + $0x108] sm:$0xff] }
  0x47   : > { %v461_v43 = vld [vmem:[%s3667_s28 + $0x6c0] sm:$0xff]  ;;  %v3164_v47 = vcombine.high %v333_v41, %v337_v42  ;;  %1873 = vmatprep.subr.bf16.mxu1 %v3300_v40  ;;  %v3163_v54 = vcombine.low %v333_v41, %v337_v42  ;;  %v282_v39 = vld [vmem:[%s3667_s28 + $0x128] sm:$0xff]  ;;  %v3117_v42 = vcombine.low %v286_v30, %v290_v31 }
  0x48   : > { %v465_v44 = vld [vmem:[%s3667_s28 + $0x6e0] sm:$0xff]  ;;  %1874 = vmatpush2.bf16.msra.mxu1 %v3299_v46  ;;  %v406_v40 = vld [vmem:[%s3667_s28 + $0x508] sm:$0xff] }
  0x49   : > { %v3292_v49 = vcombine.high %v461_v43, %v465_v44  ;;  %v325_v50 = vld [vmem:[%s3667_s28 + $0x280] sm:$0xff]  ;;  %1834 = vmatprep.subr.bf16.mxu0 %v3164_v47  ;;  %v3291_v55 = vcombine.low %v461_v43, %v465_v44  ;;  %v410_v41 = vld [vmem:[%s3667_s28 + $0x528] sm:$0xff]  ;;  %v3245_v43 = vcombine.low %v414_v32, %v418_v33  ;;  %v3110_v44 = vcombine.high %v278_v38, %v282_v39 }
  0x4a   : > { %v329_v51 = vld [vmem:[%s3667_s28 + $0x2a0] sm:$0xff]  ;;  %1835 = vmatpush2.bf16.msra.mxu0 %v3163_v54  ;;  %v3238_v45 = vcombine.high %v406_v40, %v410_v41  ;;  %v270_v46 = vld [vmem:[%s3667_s28 + $0xc8] sm:$0xff] }
  0x4b   : > { %v453_v52 = vld [vmem:[%s3667_s28 + $0x680] sm:$0xff]  ;;  %v3156_v56 = vcombine.high %v325_v50, %v329_v51  ;;  %1875 = vmatprep.subr.bf16.mxu1 %v3292_v49  ;;  %v3155_v0 = vcombine.low %v325_v50, %v329_v51  ;;  %v274_v47 = vld [vmem:[%s3667_s28 + $0xe8] sm:$0xff]  ;;  %v3109_v51 = vcombine.low %v278_v38, %v282_v39 }
  0x4c   : > { %v457_v53 = vld [vmem:[%s3667_s28 + $0x6a0] sm:$0xff]  ;;  %1876 = vmatpush2.bf16.msra.mxu1 %v3291_v55  ;;  %v398_v49 = vld [vmem:[%s3667_s28 + $0x4c8] sm:$0xff] }
  0x4d   : > { %v3284_v58 = vcombine.high %v453_v52, %v457_v53  ;;  %v317_v59 = vld [vmem:[%s3667_s28 + $0x240] sm:$0xff]  ;;  %1836 = vmatprep.subr.bf16.mxu0 %v3156_v56  ;;  %v3283_v1 = vcombine.low %v453_v52, %v457_v53  ;;  %v402_v50 = vld [vmem:[%s3667_s28 + $0x4e8] sm:$0xff]  ;;  %v3237_v52 = vcombine.low %v406_v40, %v410_v41  ;;  %v3102_v53 = vcombine.high %v270_v46, %v274_v47 }
  0x4e   : > { %v321_v61 = vld [vmem:[%s3667_s28 + $0x260] sm:$0xff]  ;;  %1837 = vmatpush2.bf16.msra.mxu0 %v3155_v0  ;;  %v3230_v54 = vcombine.high %v398_v49, %v402_v50  ;;  %v262_v55 = vld [vmem:[%s3667_s28 + $0x88] sm:$0xff] }
  0x4f   : > { %v445_v62 = vld [vmem:[%s3667_s28 + $0x640] sm:$0xff]  ;;  %v3148_v2 = vcombine.high %v317_v59, %v321_v61  ;;  %1877 = vmatprep.subr.bf16.mxu1 %v3284_v58  ;;  %v3147_v9 = vcombine.low %v317_v59, %v321_v61  ;;  %v266_v56 = vld [vmem:[%s3667_s28 + $0xa8] sm:$0xff]  ;;  %v3101_v61 = vcombine.low %v270_v46, %v274_v47 }
  0x50   : > { %v449_v63 = vld [vmem:[%s3667_s28 + $0x660] sm:$0xff]  ;;  %1878 = vmatpush2.bf16.msra.mxu1 %v3283_v1  ;;  %v390_v58 = vld [vmem:[%s3667_s28 + $0x488] sm:$0xff] }
  0x51   : > { %v3276_v3 = vcombine.high %v445_v62, %v449_v63  ;;  %v309_v5 = vld [vmem:[%s3667_s28 + $0x200] sm:$0xff]  ;;  %1838 = vmatprep.subr.bf16.mxu0 %v3148_v2  ;;  %v3275_v11 = vcombine.low %v445_v62, %v449_v63  ;;  %v394_v59 = vld [vmem:[%s3667_s28 + $0x4a8] sm:$0xff]  ;;  %v3229_v62 = vcombine.low %v398_v49, %v402_v50  ;;  %v3094_v63 = vcombine.high %v262_v55, %v266_v56 }
  0x52   : > { %v313_v6 = vld [vmem:[%s3667_s28 + $0x220] sm:$0xff]  ;;  %1839 = vmatpush2.bf16.msra.mxu0 %v3147_v9  ;;  %v3222_v0 = vcombine.high %v390_v58, %v394_v59  ;;  %v254_v1 = vld [vmem:[%s3667_s28 + $0x48] sm:$0xff] }
  0x53   : > { %v437_v7 = vld [vmem:[%s3667_s28 + $0x600] sm:$0xff]  ;;  %v3140_v12 = vcombine.high %v309_v5, %v313_v6  ;;  %1879 = vmatprep.subr.bf16.mxu1 %v3276_v3  ;;  %v3139_v18 = vcombine.low %v309_v5, %v313_v6  ;;  %v258_v2 = vld [vmem:[%s3667_s28 + $0x68] sm:$0xff]  ;;  %v3093_v6 = vcombine.low %v262_v55, %v266_v56 }
  0x54   : > { %v441_v8 = vld [vmem:[%s3667_s28 + $0x620] sm:$0xff]  ;;  %1880 = vmatpush2.bf16.msra.mxu1 %v3275_v11  ;;  %v382_v3 = vld [vmem:[%s3667_s28 + $0x448] sm:$0xff]  ;;  %v3085_v15 = vcombine.low %v254_v1, %v258_v2 }
  0x55   : > { %v3268_v13 = vcombine.high %v437_v7, %v441_v8  ;;  %1840 = vmatprep.subr.bf16.mxu0 %v3140_v12  ;;  %v3267_v20 = vcombine.low %v437_v7, %v441_v8  ;;  %v386_v5 = vld [vmem:[%s3667_s28 + $0x468] sm:$0xff]  ;;  %v3221_v7 = vcombine.low %v390_v58, %v394_v59  ;;  %v3086_v8 = vcombine.high %v254_v1, %v258_v2 }
  0x56   : > { %1841 = vmatpush2.bf16.msra.mxu0 %v3139_v18  ;;  %v3214_v9 = vcombine.high %v382_v3, %v386_v5  ;;  %v246_v11 = vld [vmem:[%s3667_s28 + $0x8] sm:$0xff]  ;;  %v3213_v16 = vcombine.low %v382_v3, %v386_v5 }
  0x57   : > { %1881 = vmatprep.subr.bf16.mxu1 %v3268_v13  ;;  %1892 = vmatprep.subr.bf16.mxu0 %v3134_v21  ;;  %v250_v12 = vld [vmem:[%s3667_s28 + $0x28] sm:$0xff] }
  0x58   : > { %1882 = vmatpush2.bf16.msra.mxu1 %v3267_v20  ;;  %v374_v13 = vld [vmem:[%s3667_s28 + $0x408] sm:$0xff]  ;;  %v3078_v17 = vcombine.high %v246_v11, %v250_v12  ;;  %v3077_v24 = vcombine.low %v246_v11, %v250_v12 }
  0x59   : > { %1933 = vmatprep.subr.bf16.mxu1 %v3262_v22  ;;  %1843 = vmatmul.mubr.bf16.vlgmr.msra.gmra.mxu0 %v3763_v19  ;;  %v3206_v18 = vcombine.high %v374_v13, %v378_v14  ;;  %v366_v20 = vld [vmem:[%s3667_s28 + $0x3c8] sm:$0xff]  ;;  %v3205_v25 = vcombine.low %v374_v13, %v378_v14 }
  0x5a   : > { %1893 = vmatpush1.bf16.msra.mxu0 %v3133_v57  ;;  %1924 = vmatprep.mubr.bf16.mxu0 %v3717_v4  ;;  %v370_v21 = vld [vmem:[%s3667_s28 + $0x3e8] sm:$0xff] }
  0x5b   : > { %1884 = vmatmul.mubr.bf16.vlgmr.msra.gmra.mxu1 %v3771_v27  ;;  %1894 = vmatprep.subr.bf16.mxu0 %v3126_v28  ;;  %v494_v22 = vld [vmem:[%s3667_s28 + $0x7c8] sm:$0xff]  ;;  %v3198_v26 = vcombine.high %v366_v20, %v370_v21  ;;  %v3197_v31 = vcombine.low %v366_v20, %v370_v21 }
  0x5c   : > { %1934 = vmatpush1.bf16.msra.mxu1 %v3261_v60  ;;  %1965 = vmatprep.mubr.bf16.mxu1 %v3724_v10  ;;  %v498_v23 = vld [vmem:[%s3667_s28 + $0x7e8] sm:$0xff] }
  0x5d   : > { %1935 = vmatprep.subr.bf16.mxu1 %v3254_v29  ;;  %v3326_v57 = vcombine.high %v494_v22, %v498_v23  ;;  %v358_v60 = vld [vmem:[%s3667_s28 + $0x388] sm:$0xff]  ;;  %v3325_v32 = vcombine.low %v494_v22, %v498_v23 }
  0x5e   : > { %1895 = vmatpush1.bf16.msra.mxu0 %v3125_v34  ;;  %v362_v28 = vld [vmem:[%s3667_s28 + $0x3a8] sm:$0xff] }
  0x5f   : > { %1896 = vmatprep.subr.bf16.mxu0 %v3118_v36  ;;  %v486_v29 = vld [vmem:[%s3667_s28 + $0x788] sm:$0xff]  ;;  %v3190_v33 = vcombine.high %v358_v60, %v362_v28  ;;  %v3189_v39 = vcombine.low %v358_v60, %v362_v28  ;;  %v435_v60 = vld [vmem:[%s3667_s28 + $0x5f0] sm:$0xff] }
  0x60   : > { %1936 = vmatpush1.bf16.msra.mxu1 %v3253_v35  ;;  %v490_v30 = vld [vmem:[%s3667_s28 + $0x7a8] sm:$0xff] }
  0x61   : > { %1937 = vmatprep.subr.bf16.mxu1 %v3246_v37  ;;  %v3318_v34 = vcombine.high %v486_v29, %v490_v30  ;;  %v350_v35 = vld [vmem:[%s3667_s28 + $0x348] sm:$0xff]  ;;  %v3317_v40 = vcombine.low %v486_v29, %v490_v30 }
  0x62   : > { %1897 = vmatpush1.bf16.msra.mxu0 %v3117_v42  ;;  %v354_v36 = vld [vmem:[%s3667_s28 + $0x368] sm:$0xff] }
  0x63   : > { %1898 = vmatprep.subr.bf16.mxu0 %v3110_v44  ;;  %v478_v37 = vld [vmem:[%s3667_s28 + $0x748] sm:$0xff]  ;;  %v3182_v41 = vcombine.high %v350_v35, %v354_v36  ;;  %v3181_v47 = vcombine.low %v350_v35, %v354_v36  ;;  %v427_v35 = vld [vmem:[%s3667_s28 + $0x5b0] sm:$0xff] }
  0x64   : > { %1938 = vmatpush1.bf16.msra.mxu1 %v3245_v43  ;;  %v482_v38 = vld [vmem:[%s3667_s28 + $0x768] sm:$0xff] }
  0x65   : > { %1939 = vmatprep.subr.bf16.mxu1 %v3238_v45  ;;  %v3310_v42 = vcombine.high %v478_v37, %v482_v38  ;;  %v342_v43 = vld [vmem:[%s3667_s28 + $0x308] sm:$0xff]  ;;  %v3309_v49 = vcombine.low %v478_v37, %v482_v38 }
  0x66   : > { %1899 = vmatpush1.bf16.msra.mxu0 %v3109_v51  ;;  %v346_v44 = vld [vmem:[%s3667_s28 + $0x328] sm:$0xff] }
  0x67   : > { %1900 = vmatprep.subr.bf16.mxu0 %v3102_v53  ;;  %v470_v45 = vld [vmem:[%s3667_s28 + $0x708] sm:$0xff]  ;;  %v3174_v50 = vcombine.high %v342_v43, %v346_v44  ;;  %v3173_v56 = vcombine.low %v342_v43, %v346_v44  ;;  %v419_v43 = vld [vmem:[%s3667_s28 + $0x570] sm:$0xff] }
  0x68   : > { %1940 = vmatpush1.bf16.msra.mxu1 %v3237_v52  ;;  %v474_v46 = vld [vmem:[%s3667_s28 + $0x728] sm:$0xff] }
  0x69   : > { %1941 = vmatprep.subr.bf16.mxu1 %v3230_v54  ;;  %v3302_v51 = vcombine.high %v470_v45, %v474_v46  ;;  %v334_v52 = vld [vmem:[%s3667_s28 + $0x2c8] sm:$0xff]  ;;  %v3301_v58 = vcombine.low %v470_v45, %v474_v46 }
  0x6a   : > { %1901 = vmatpush1.bf16.msra.mxu0 %v3101_v61  ;;  %v338_v53 = vld [vmem:[%s3667_s28 + $0x2e8] sm:$0xff] }
  0x6b   : > { %1902 = vmatprep.subr.bf16.mxu0 %v3094_v63  ;;  %v462_v54 = vld [vmem:[%s3667_s28 + $0x6c8] sm:$0xff]  ;;  %v3166_v59 = vcombine.high %v334_v52, %v338_v53  ;;  %v3165_v2 = vcombine.low %v334_v52, %v338_v53  ;;  %v411_v52 = vld [vmem:[%s3667_s28 + $0x530] sm:$0xff] }
  0x6c   : > { %1942 = vmatpush1.bf16.msra.mxu1 %v3229_v62  ;;  %v466_v55 = vld [vmem:[%s3667_s28 + $0x6e8] sm:$0xff] }
  0x6d   : > { %1943 = vmatprep.subr.bf16.mxu1 %v3222_v0  ;;  %v3294_v61 = vcombine.high %v462_v54, %v466_v55  ;;  %v326_v62 = vld [vmem:[%s3667_s28 + $0x288] sm:$0xff]  ;;  %v3293_v3 = vcombine.low %v462_v54, %v466_v55 }
  0x6e   : > { %1903 = vmatpush1.bf16.msra.mxu0 %v3093_v6  ;;  %v330_v63 = vld [vmem:[%s3667_s28 + $0x2a8] sm:$0xff] }
  0x6f   : > { %1904 = vmatprep.subr.bf16.mxu0 %v3086_v8  ;;  %v454_v0 = vld [vmem:[%s3667_s28 + $0x688] sm:$0xff]  ;;  %v3158_v5 = vcombine.high %v326_v62, %v330_v63  ;;  %v3157_v12 = vcombine.low %v326_v62, %v330_v63  ;;  %v403_v62 = vld [vmem:[%s3667_s28 + $0x4f0] sm:$0xff] }
  0x70   : > { %1944 = vmatpush1.bf16.msra.mxu1 %v3221_v7  ;;  %v458_v1 = vld [vmem:[%s3667_s28 + $0x6a8] sm:$0xff] }
  0x71   : > { %1945 = vmatprep.subr.bf16.mxu1 %v3214_v9  ;;  %v3286_v6 = vcombine.high %v454_v0, %v458_v1  ;;  %v318_v7 = vld [vmem:[%s3667_s28 + $0x248] sm:$0xff]  ;;  %v3285_v13 = vcombine.low %v454_v0, %v458_v1 }
  0x72   : > { %1905 = vmatpush1.bf16.msra.mxu0 %v3085_v15  ;;  %v322_v8 = vld [vmem:[%s3667_s28 + $0x268] sm:$0xff] }
  0x73   : > { %1906 = vmatprep.subr.bf16.mxu0 %v3078_v17  ;;  %v446_v9 = vld [vmem:[%s3667_s28 + $0x648] sm:$0xff]  ;;  %v3150_v14 = vcombine.high %v318_v7, %v322_v8  ;;  %v3149_v21 = vcombine.low %v318_v7, %v322_v8  ;;  %v395_v7 = vld [vmem:[%s3667_s28 + $0x4b0] sm:$0xff] }
  0x74   : > { %1946 = vmatpush1.bf16.msra.mxu1 %v3213_v16  ;;  %v450_v11 = vld [vmem:[%s3667_s28 + $0x668] sm:$0xff] }
  0x75   : > { %1947 = vmatprep.subr.bf16.mxu1 %v3206_v18  ;;  %v3278_v15 = vcombine.high %v446_v9, %v450_v11  ;;  %v310_v16 = vld [vmem:[%s3667_s28 + $0x208] sm:$0xff]  ;;  %v3277_v22 = vcombine.low %v446_v9, %v450_v11 }
  0x76   : > { %1907 = vmatpush1.bf16.msra.mxu0 %v3077_v24  ;;  %v314_v17 = vld [vmem:[%s3667_s28 + $0x228] sm:$0xff] }
  0x77   : > { %1908 = vmatprep.subr.bf16.mxu0 %v3198_v26  ;;  %v438_v18 = vld [vmem:[%s3667_s28 + $0x608] sm:$0xff]  ;;  %v3142_v23 = vcombine.high %v310_v16, %v314_v17  ;;  %v307_v26 = vld [vmem:[%s3667_s28 + $0x1f0] sm:$0xff]  ;;  %v3141_v28 = vcombine.low %v310_v16, %v314_v17 }
  0x78   : > { %1948 = vmatpush1.bf16.msra.mxu1 %v3205_v25  ;;  %v442_v20 = vld [vmem:[%s3667_s28 + $0x628] sm:$0xff]  ;;  %v303_v25 = vld [vmem:[%s3667_s28 + $0x1d0] sm:$0xff] }
  0x79   : > { %1949 = vmatprep.subr.bf16.mxu1 %v3326_v57  ;;  %v3270_v24 = vcombine.high %v438_v18, %v442_v20  ;;  %v431_v57 = vld [vmem:[%s3667_s28 + $0x5d0] sm:$0xff]  ;;  %v3269_v29 = vcombine.low %v438_v18, %v442_v20  ;;  %v3136_v30 = vcombine.high %v303_v25, %v307_v26  ;;  %v3135_v36 = vcombine.low %v303_v25, %v307_v26 }
  0x7a   : > { %1909 = vmatpush2.bf16.msra.mxu0 %v3197_v31  ;;  %v3264_v31 = vcombine.high %v431_v57, %v435_v60  ;;  %v3263_v37 = vcombine.low %v431_v57, %v435_v60  ;;  %v387_v16 = vld [vmem:[%s3667_s28 + $0x470] sm:$0xff] }
  0x7b   : > { %1910 = vmatprep.subr.bf16.mxu0 %v3190_v33  ;;  %v299_v33 = vld [vmem:[%s3667_s28 + $0x1b0] sm:$0xff] }
  0x7c   : > { %1950 = vmatpush2.bf16.msra.mxu1 %v3325_v32  ;;  %v295_v32 = vld [vmem:[%s3667_s28 + $0x190] sm:$0xff] }
  0x7d   : > { %1951 = vmatprep.subr.bf16.mxu1 %v3318_v34  ;;  %v423_v34 = vld [vmem:[%s3667_s28 + $0x590] sm:$0xff]  ;;  %v3128_v38 = vcombine.high %v295_v32, %v299_v33  ;;  %v3127_v44 = vcombine.low %v295_v32, %v299_v33 }
  0x7e   : > { %1911 = vmatpush2.bf16.msra.mxu0 %v3189_v39  ;;  %v3256_v39 = vcombine.high %v423_v34, %v427_v35  ;;  %v3255_v45 = vcombine.low %v423_v34, %v427_v35  ;;  %v379_v25 = vld [vmem:[%s3667_s28 + $0x430] sm:$0xff] }
  0x7f   : > { %1912 = vmatprep.subr.bf16.mxu0 %v3182_v41  ;;  %v291_v41 = vld [vmem:[%s3667_s28 + $0x170] sm:$0xff] }
  0x80   : > { %1952 = vmatpush2.bf16.msra.mxu1 %v3317_v40  ;;  %v287_v40 = vld [vmem:[%s3667_s28 + $0x150] sm:$0xff] }
  0x81   : > { %1953 = vmatprep.subr.bf16.mxu1 %v3310_v42  ;;  %v415_v42 = vld [vmem:[%s3667_s28 + $0x550] sm:$0xff]  ;;  %v3120_v46 = vcombine.high %v287_v40, %v291_v41  ;;  %v3119_v53 = vcombine.low %v287_v40, %v291_v41 }
  0x82   : > { %1913 = vmatpush2.bf16.msra.mxu0 %v3181_v47  ;;  %v3248_v47 = vcombine.high %v415_v42, %v419_v43  ;;  %v3247_v54 = vcombine.low %v415_v42, %v419_v43  ;;  %v499_v32 = vld [vmem:[%s3667_s28 + $0x7f0] sm:$0xff] }
  0x83   : > { %1914 = vmatprep.subr.bf16.mxu0 %v3174_v50  ;;  %v283_v50 = vld [vmem:[%s3667_s28 + $0x130] sm:$0xff] }
  0x84   : > { %1954 = vmatpush2.bf16.msra.mxu1 %v3309_v49  ;;  %v279_v49 = vld [vmem:[%s3667_s28 + $0x110] sm:$0xff] }
  0x85   : > { %1955 = vmatprep.subr.bf16.mxu1 %v3302_v51  ;;  %v407_v51 = vld [vmem:[%s3667_s28 + $0x510] sm:$0xff]  ;;  %v3112_v55 = vcombine.high %v279_v49, %v283_v50  ;;  %v3111_v63 = vcombine.low %v279_v49, %v283_v50 }
  0x86   : > { %1915 = vmatpush2.bf16.msra.mxu0 %v3173_v56  ;;  %v3240_v56 = vcombine.high %v407_v51, %v411_v52  ;;  %v3239_v0 = vcombine.low %v407_v51, %v411_v52  ;;  %v491_v40 = vld [vmem:[%s3667_s28 + $0x7b0] sm:$0xff] }
  0x87   : > { %1916 = vmatprep.subr.bf16.mxu0 %v3166_v59  ;;  %v275_v59 = vld [vmem:[%s3667_s28 + $0xf0] sm:$0xff] }
  0x88   : > { %1956 = vmatpush2.bf16.msra.mxu1 %v3301_v58  ;;  %v271_v58 = vld [vmem:[%s3667_s28 + $0xd0] sm:$0xff] }
  0x89   : > { %1957 = vmatprep.subr.bf16.mxu1 %v3294_v61  ;;  %v399_v61 = vld [vmem:[%s3667_s28 + $0x4d0] sm:$0xff]  ;;  %v3104_v1 = vcombine.high %v271_v58, %v275_v59  ;;  %v3103_v8 = vcombine.low %v271_v58, %v275_v59 }
  0x8a   : > { %1917 = vmatpush2.bf16.msra.mxu0 %v3165_v2  ;;  %v3232_v2 = vcombine.high %v399_v61, %v403_v62  ;;  %v3231_v9 = vcombine.low %v399_v61, %v403_v62  ;;  %v483_v49 = vld [vmem:[%s3667_s28 + $0x770] sm:$0xff] }
  0x8b   : > { %1918 = vmatprep.subr.bf16.mxu0 %v3158_v5  ;;  %v267_v5 = vld [vmem:[%s3667_s28 + $0xb0] sm:$0xff] }
  0x8c   : > { %1958 = vmatpush2.bf16.msra.mxu1 %v3293_v3  ;;  %v263_v3 = vld [vmem:[%s3667_s28 + $0x90] sm:$0xff] }
  0x8d   : > { %1959 = vmatprep.subr.bf16.mxu1 %v3286_v6  ;;  %v391_v6 = vld [vmem:[%s3667_s28 + $0x490] sm:$0xff]  ;;  %v3096_v11 = vcombine.high %v263_v3, %v267_v5  ;;  %v3095_v17 = vcombine.low %v263_v3, %v267_v5 }
  0x8e   : > { %1919 = vmatpush2.bf16.msra.mxu0 %v3157_v12  ;;  %v3224_v12 = vcombine.high %v391_v6, %v395_v7  ;;  %v3223_v18 = vcombine.low %v391_v6, %v395_v7  ;;  %v475_v58 = vld [vmem:[%s3667_s28 + $0x730] sm:$0xff] }
  0x8f   : > { %1920 = vmatprep.subr.bf16.mxu0 %v3150_v14  ;;  %v259_v14 = vld [vmem:[%s3667_s28 + $0x70] sm:$0xff] }
  0x90   : > { %1960 = vmatpush2.bf16.msra.mxu1 %v3285_v13  ;;  %v255_v13 = vld [vmem:[%s3667_s28 + $0x50] sm:$0xff] }
  0x91   : > { %1961 = vmatprep.subr.bf16.mxu1 %v3278_v15  ;;  %v383_v15 = vld [vmem:[%s3667_s28 + $0x450] sm:$0xff]  ;;  %v3088_v20 = vcombine.high %v255_v13, %v259_v14  ;;  %v3087_v26 = vcombine.low %v255_v13, %v259_v14 }
  0x92   : > { %1921 = vmatpush2.bf16.msra.mxu0 %v3149_v21  ;;  %v3216_v21 = vcombine.high %v383_v15, %v387_v16  ;;  %v3215_v57 = vcombine.low %v383_v15, %v387_v16  ;;  %v467_v3 = vld [vmem:[%s3667_s28 + $0x6f0] sm:$0xff] }
  0x93   : > { %1922 = vmatprep.subr.bf16.mxu0 %v3142_v23  ;;  %v251_v23 = vld [vmem:[%s3667_s28 + $0x30] sm:$0xff] }
  0x94   : > { %1962 = vmatpush2.bf16.msra.mxu1 %v3277_v22  ;;  %v247_v22 = vld [vmem:[%s3667_s28 + $0x10] sm:$0xff] }
  0x95   : > { %1963 = vmatprep.subr.bf16.mxu1 %v3270_v24  ;;  %v375_v24 = vld [vmem:[%s3667_s28 + $0x410] sm:$0xff]  ;;  %v3080_v60 = vcombine.high %v247_v22, %v251_v23  ;;  %v3079_v33 = vcombine.low %v247_v22, %v251_v23 }
  0x96   : > { %1923 = vmatpush2.bf16.msra.mxu0 %v3141_v28  ;;  %v3208_v28 = vcombine.high %v375_v24, %v379_v25  ;;  %v3207_v34 = vcombine.low %v375_v24, %v379_v25  ;;  %v459_v13 = vld [vmem:[%s3667_s28 + $0x6b0] sm:$0xff] }
  0x97   : > { %1974 = vmatprep.subr.bf16.mxu0 %v3136_v30  ;;  %v371_v30 = vld [vmem:[%s3667_s28 + $0x3f0] sm:$0xff] }
  0x98   : > { %1964 = vmatpush2.bf16.msra.mxu1 %v3269_v29  ;;  %v367_v29 = vld [vmem:[%s3667_s28 + $0x3d0] sm:$0xff] }
  0x99   : > { %2015 = vmatprep.subr.bf16.mxu1 %v3264_v31  ;;  %1925 = vmatmul.mubr.bf16.vlgmr.msra.gmra.mxu0 %v3763_v19  ;;  %v495_v31 = vld [vmem:[%s3667_s28 + $0x7d0] sm:$0xff]  ;;  %v3200_v35 = vcombine.high %v367_v29, %v371_v30  ;;  %v3199_v41 = vcombine.low %v367_v29, %v371_v30 }
  0x9a   : > { %1975 = vmatpush1.bf16.msra.mxu0 %v3135_v36  ;;  %2006 = vmatprep.mubr.bf16.mxu0 %v3717_v4  ;;  %v3328_v36 = vcombine.high %v495_v31, %v499_v32  ;;  %v3327_v42 = vcombine.low %v495_v31, %v499_v32  ;;  %v451_v22 = vld [vmem:[%s3667_s28 + $0x670] sm:$0xff] }
  0x9b   : > { %1966 = vmatmul.mubr.bf16.vlgmr.msra.gmra.mxu1 %v3771_v27  ;;  %1976 = vmatprep.subr.bf16.mxu0 %v3128_v38  ;;  %v363_v38 = vld [vmem:[%s3667_s28 + $0x3b0] sm:$0xff] }
  0x9c   : > { %2016 = vmatpush1.bf16.msra.mxu1 %v3263_v37  ;;  %2047 = vmatprep.mubr.bf16.mxu1 %v3724_v10  ;;  %v359_v37 = vld [vmem:[%s3667_s28 + $0x390] sm:$0xff] }
  0x9d   : > { %2017 = vmatprep.subr.bf16.mxu1 %v3256_v39  ;;  %v487_v39 = vld [vmem:[%s3667_s28 + $0x790] sm:$0xff]  ;;  %v3192_v43 = vcombine.high %v359_v37, %v363_v38  ;;  %v3191_v50 = vcombine.low %v359_v37, %v363_v38  ;;  %v436_v37 = vld [vmem:[%s3667_s28 + $0x5f8] sm:$0xff] }
  0x9e   : > { %1977 = vmatpush1.bf16.msra.mxu0 %v3127_v44  ;;  %v3320_v44 = vcombine.high %v487_v39, %v491_v40  ;;  %v3319_v51 = vcombine.low %v487_v39, %v491_v40  ;;  %v443_v29 = vld [vmem:[%s3667_s28 + $0x630] sm:$0xff] }
  0x9f   : > { %1978 = vmatprep.subr.bf16.mxu0 %v3120_v46  ;;  %v355_v46 = vld [vmem:[%s3667_s28 + $0x370] sm:$0xff] }
  0xa0   : > { %2018 = vmatpush1.bf16.msra.mxu1 %v3255_v45  ;;  %v351_v45 = vld [vmem:[%s3667_s28 + $0x350] sm:$0xff] }
  0xa1   : > { %2019 = vmatprep.subr.bf16.mxu1 %v3248_v47  ;;  %v479_v47 = vld [vmem:[%s3667_s28 + $0x750] sm:$0xff]  ;;  %v3184_v52 = vcombine.high %v351_v45, %v355_v46  ;;  %v3183_v59 = vcombine.low %v351_v45, %v355_v46  ;;  %v428_v45 = vld [vmem:[%s3667_s28 + $0x5b8] sm:$0xff] }
  0xa2   : > { %1979 = vmatpush1.bf16.msra.mxu0 %v3119_v53  ;;  %v3312_v53 = vcombine.high %v479_v47, %v483_v49  ;;  %v3311_v61 = vcombine.low %v479_v47, %v483_v49 }
  0xa3   : > { %1980 = vmatprep.subr.bf16.mxu0 %v3112_v55  ;;  %v347_v55 = vld [vmem:[%s3667_s28 + $0x330] sm:$0xff] }
  0xa4   : > { %2020 = vmatpush1.bf16.msra.mxu1 %v3247_v54  ;;  %v343_v54 = vld [vmem:[%s3667_s28 + $0x310] sm:$0xff] }
  0xa5   : > { %2021 = vmatprep.subr.bf16.mxu1 %v3240_v56  ;;  %v471_v56 = vld [vmem:[%s3667_s28 + $0x710] sm:$0xff]  ;;  %v3176_v62 = vcombine.high %v343_v54, %v347_v55  ;;  %v3175_v5 = vcombine.low %v343_v54, %v347_v55  ;;  %v420_v54 = vld [vmem:[%s3667_s28 + $0x578] sm:$0xff] }
  0xa6   : > { %1981 = vmatpush1.bf16.msra.mxu0 %v3111_v63  ;;  %v3304_v63 = vcombine.high %v471_v56, %v475_v58  ;;  %v3303_v6 = vcombine.low %v471_v56, %v475_v58 }
  0xa7   : > { %1982 = vmatprep.subr.bf16.mxu0 %v3104_v1  ;;  %v339_v1 = vld [vmem:[%s3667_s28 + $0x2f0] sm:$0xff] }
  0xa8   : > { %2022 = vmatpush1.bf16.msra.mxu1 %v3239_v0  ;;  %v335_v0 = vld [vmem:[%s3667_s28 + $0x2d0] sm:$0xff] }
  0xa9   : > { %2023 = vmatprep.subr.bf16.mxu1 %v3232_v2  ;;  %v463_v2 = vld [vmem:[%s3667_s28 + $0x6d0] sm:$0xff]  ;;  %v3168_v7 = vcombine.high %v335_v0, %v339_v1  ;;  %v3167_v14 = vcombine.low %v335_v0, %v339_v1  ;;  %v412_v0 = vld [vmem:[%s3667_s28 + $0x538] sm:$0xff] }
  0xaa   : > { %1983 = vmatpush1.bf16.msra.mxu0 %v3103_v8  ;;  %v3296_v8 = vcombine.high %v463_v2, %v467_v3  ;;  %v3295_v15 = vcombine.low %v463_v2, %v467_v3 }
  0xab   : > { %1984 = vmatprep.subr.bf16.mxu0 %v3096_v11  ;;  %v331_v11 = vld [vmem:[%s3667_s28 + $0x2b0] sm:$0xff] }
  0xac   : > { %2024 = vmatpush1.bf16.msra.mxu1 %v3231_v9  ;;  %v327_v9 = vld [vmem:[%s3667_s28 + $0x290] sm:$0xff] }
  0xad   : > { %2025 = vmatprep.subr.bf16.mxu1 %v3224_v12  ;;  %v455_v12 = vld [vmem:[%s3667_s28 + $0x690] sm:$0xff]  ;;  %v3160_v16 = vcombine.high %v327_v9, %v331_v11  ;;  %v3159_v23 = vcombine.low %v327_v9, %v331_v11 }
  0xae   : > { %1985 = vmatpush1.bf16.msra.mxu0 %v3095_v17  ;;  %v3288_v17 = vcombine.high %v455_v12, %v459_v13  ;;  %v3287_v24 = vcombine.low %v455_v12, %v459_v13  ;;  %v264_v13 = vld [vmem:[%s3667_s28 + $0x98] sm:$0xff] }
  0xaf   : > { %1986 = vmatprep.subr.bf16.mxu0 %v3088_v20  ;;  %v323_v20 = vld [vmem:[%s3667_s28 + $0x270] sm:$0xff] }
  0xb0   : > { %2026 = vmatpush1.bf16.msra.mxu1 %v3223_v18  ;;  %v319_v18 = vld [vmem:[%s3667_s28 + $0x250] sm:$0xff] }
  0xb1   : > { %2027 = vmatprep.subr.bf16.mxu1 %v3216_v21  ;;  %v447_v21 = vld [vmem:[%s3667_s28 + $0x650] sm:$0xff]  ;;  %v3152_v25 = vcombine.high %v319_v18, %v323_v20  ;;  %v3151_v30 = vcombine.low %v319_v18, %v323_v20 }
  0xb2   : > { %1987 = vmatpush1.bf16.msra.mxu0 %v3087_v26  ;;  %v3280_v26 = vcombine.high %v447_v21, %v451_v22  ;;  %v3279_v31 = vcombine.low %v447_v21, %v451_v22  ;;  %v256_v22 = vld [vmem:[%s3667_s28 + $0x58] sm:$0xff] }
  0xb3   : > { %1988 = vmatprep.subr.bf16.mxu0 %v3080_v60  ;;  %v315_v60 = vld [vmem:[%s3667_s28 + $0x230] sm:$0xff] }
  0xb4   : > { %2028 = vmatpush1.bf16.msra.mxu1 %v3215_v57  ;;  %v311_v57 = vld [vmem:[%s3667_s28 + $0x210] sm:$0xff] }
  0xb5   : > { %2029 = vmatprep.subr.bf16.mxu1 %v3208_v28  ;;  %v439_v28 = vld [vmem:[%s3667_s28 + $0x610] sm:$0xff]  ;;  %v3144_v32 = vcombine.high %v311_v57, %v315_v60  ;;  %v3143_v38 = vcombine.low %v311_v57, %v315_v60 }
  0xb6   : > { %1989 = vmatpush1.bf16.msra.mxu0 %v3079_v33  ;;  %v3272_v33 = vcombine.high %v439_v28, %v443_v29  ;;  %v3271_v39 = vcombine.low %v439_v28, %v443_v29  ;;  %v248_v29 = vld [vmem:[%s3667_s28 + $0x18] sm:$0xff] }
  0xb7   : > { %1990 = vmatprep.subr.bf16.mxu0 %v3200_v35  ;;  %v308_v35 = vld [vmem:[%s3667_s28 + $0x1f8] sm:$0xff] }
  0xb8   : > { %2030 = vmatpush1.bf16.msra.mxu1 %v3207_v34  ;;  %v304_v34 = vld [vmem:[%s3667_s28 + $0x1d8] sm:$0xff] }
  0xb9   : > { %2031 = vmatprep.subr.bf16.mxu1 %v3328_v36  ;;  %v432_v36 = vld [vmem:[%s3667_s28 + $0x5d8] sm:$0xff]  ;;  %v3138_v40 = vcombine.high %v304_v34, %v308_v35  ;;  %v3137_v46 = vcombine.low %v304_v34, %v308_v35 }
  0xba   : > { %1991 = vmatpush2.bf16.msra.mxu0 %v3199_v41  ;;  %v3266_v41 = vcombine.high %v432_v36, %v436_v37  ;;  %v3265_v47 = vcombine.low %v432_v36, %v436_v37  ;;  %v368_v37 = vld [vmem:[%s3667_s28 + $0x3d8] sm:$0xff] }
  0xbb   : > { %1992 = vmatprep.subr.bf16.mxu0 %v3192_v43  ;;  %v300_v43 = vld [vmem:[%s3667_s28 + $0x1b8] sm:$0xff] }
  0xbc   : > { %2032 = vmatpush2.bf16.msra.mxu1 %v3327_v42  ;;  %v296_v42 = vld [vmem:[%s3667_s28 + $0x198] sm:$0xff] }
  0xbd   : > { %2033 = vmatprep.subr.bf16.mxu1 %v3320_v44  ;;  %v424_v44 = vld [vmem:[%s3667_s28 + $0x598] sm:$0xff]  ;;  %v3130_v49 = vcombine.high %v296_v42, %v300_v43  ;;  %v3129_v55 = vcombine.low %v296_v42, %v300_v43 }
  0xbe   : > { %1993 = vmatpush2.bf16.msra.mxu0 %v3191_v50  ;;  %v3258_v50 = vcombine.high %v424_v44, %v428_v45  ;;  %v3257_v56 = vcombine.low %v424_v44, %v428_v45  ;;  %v360_v45 = vld [vmem:[%s3667_s28 + $0x398] sm:$0xff] }
  0xbf   : > { %1994 = vmatprep.subr.bf16.mxu0 %v3184_v52  ;;  %v292_v52 = vld [vmem:[%s3667_s28 + $0x178] sm:$0xff] }
  0xc0   : > { %2034 = vmatpush2.bf16.msra.mxu1 %v3319_v51  ;;  %v288_v51 = vld [vmem:[%s3667_s28 + $0x158] sm:$0xff] }
  0xc1   : > { %2035 = vmatprep.subr.bf16.mxu1 %v3312_v53  ;;  %v416_v53 = vld [vmem:[%s3667_s28 + $0x558] sm:$0xff]  ;;  %v3122_v58 = vcombine.high %v288_v51, %v292_v52  ;;  %v3121_v1 = vcombine.low %v288_v51, %v292_v52 }
  0xc2   : > { %1995 = vmatpush2.bf16.msra.mxu0 %v3183_v59  ;;  %v3250_v59 = vcombine.high %v416_v53, %v420_v54  ;;  %v3249_v2 = vcombine.low %v416_v53, %v420_v54  ;;  %v352_v54 = vld [vmem:[%s3667_s28 + $0x358] sm:$0xff] }
  0xc3   : > { %1996 = vmatprep.subr.bf16.mxu0 %v3176_v62  ;;  %v284_v62 = vld [vmem:[%s3667_s28 + $0x138] sm:$0xff] }
  0xc4   : > { %2036 = vmatpush2.bf16.msra.mxu1 %v3311_v61  ;;  %v280_v61 = vld [vmem:[%s3667_s28 + $0x118] sm:$0xff] }
  0xc5   : > { %2037 = vmatprep.subr.bf16.mxu1 %v3304_v63  ;;  %v408_v63 = vld [vmem:[%s3667_s28 + $0x518] sm:$0xff]  ;;  %v3114_v3 = vcombine.high %v280_v61, %v284_v62  ;;  %v3113_v9 = vcombine.low %v280_v61, %v284_v62 }
  0xc6   : > { %1997 = vmatpush2.bf16.msra.mxu0 %v3175_v5  ;;  %v3242_v5 = vcombine.high %v408_v63, %v412_v0 }
  0xc7   : > { %1998 = vmatprep.subr.bf16.mxu0 %v3168_v7  ;;  %v276_v7 = vld [vmem:[%s3667_s28 + $0xf8] sm:$0xff] }
  0xc8   : > { %2038 = vmatpush2.bf16.msra.mxu1 %v3303_v6  ;;  %v272_v6 = vld [vmem:[%s3667_s28 + $0xd8] sm:$0xff] }
  0xc9   : > { %2039 = vmatprep.subr.bf16.mxu1 %v3296_v8  ;;  %v400_v8 = vld [vmem:[%s3667_s28 + $0x4d8] sm:$0xff]  ;;  %v3106_v11 = vcombine.high %v272_v6, %v276_v7 }
  0xca   : > { %1999 = vmatpush2.bf16.msra.mxu0 %v3167_v14  ;;  %v268_v14 = vld [vmem:[%s3667_s28 + $0xb8] sm:$0xff] }
  0xcb   : > { %2000 = vmatprep.subr.bf16.mxu0 %v3160_v16  ;;  %v396_v16 = vld [vmem:[%s3667_s28 + $0x4b8] sm:$0xff]  ;;  %v3098_v20 = vcombine.high %v264_v13, %v268_v14 }
  0xcc   : > { %2040 = vmatpush2.bf16.msra.mxu1 %v3295_v15  ;;  %v392_v15 = vld [vmem:[%s3667_s28 + $0x498] sm:$0xff] }
  0xcd   : > { %2041 = vmatprep.subr.bf16.mxu1 %v3288_v17  ;;  %v3105_v17 = vcombine.low %v272_v6, %v276_v7  ;;  %v3226_v21 = vcombine.high %v392_v15, %v396_v16  ;;  %v3225_v57 = vcombine.low %v392_v15, %v396_v16  ;;  %v328_v16 = vld [vmem:[%s3667_s28 + $0x298] sm:$0xff] }
  0xce   : > { %2001 = vmatpush2.bf16.msra.mxu0 %v3159_v23  ;;  %v260_v23 = vld [vmem:[%s3667_s28 + $0x78] sm:$0xff] }
  0xcf   : > { %2002 = vmatprep.subr.bf16.mxu0 %v3152_v25  ;;  %v388_v25 = vld [vmem:[%s3667_s28 + $0x478] sm:$0xff]  ;;  %v3090_v60 = vcombine.high %v256_v22, %v260_v23 }
  0xd0   : > { %2042 = vmatpush2.bf16.msra.mxu1 %v3287_v24  ;;  %v384_v24 = vld [vmem:[%s3667_s28 + $0x458] sm:$0xff] }
  0xd1   : > { %2043 = vmatprep.subr.bf16.mxu1 %v3280_v26  ;;  %v3097_v26 = vcombine.low %v264_v13, %v268_v14  ;;  %v3218_v28 = vcombine.high %v384_v24, %v388_v25  ;;  %v3217_v34 = vcombine.low %v384_v24, %v388_v25  ;;  %v320_v25 = vld [vmem:[%s3667_s28 + $0x258] sm:$0xff] }
  0xd2   : > { %2003 = vmatpush2.bf16.msra.mxu0 %v3151_v30  ;;  %v252_v30 = vld [vmem:[%s3667_s28 + $0x38] sm:$0xff] }
  0xd3   : > { %2004 = vmatprep.subr.bf16.mxu0 %v3144_v32  ;;  %v380_v32 = vld [vmem:[%s3667_s28 + $0x438] sm:$0xff]  ;;  %v3082_v35 = vcombine.high %v248_v29, %v252_v30 }
  0xd4   : > { %2044 = vmatpush2.bf16.msra.mxu1 %v3279_v31  ;;  %v376_v31 = vld [vmem:[%s3667_s28 + $0x418] sm:$0xff] }
  0xd5   : > { %2045 = vmatprep.subr.bf16.mxu1 %v3272_v33  ;;  %v3089_v33 = vcombine.low %v256_v22, %v260_v23  ;;  %v3210_v36 = vcombine.high %v376_v31, %v380_v32  ;;  %v3209_v42 = vcombine.low %v376_v31, %v380_v32  ;;  %v312_v32 = vld [vmem:[%s3667_s28 + $0x218] sm:$0xff] }
  0xd6   : > { %2005 = vmatpush2.bf16.msra.mxu0 %v3143_v38  ;;  %v372_v38 = vld [vmem:[%s3667_s28 + $0x3f8] sm:$0xff] }
  0xd7   : > { %2056 = vmatprep.subr.bf16.mxu0 %v3138_v40  ;;  %v500_v40 = vld [vmem:[%s3667_s28 + $0x7f8] sm:$0xff]  ;;  %v3202_v43 = vcombine.high %v368_v37, %v372_v38 }
  0xd8   : > { %2046 = vmatpush2.bf16.msra.mxu1 %v3271_v39  ;;  %v496_v39 = vld [vmem:[%s3667_s28 + $0x7d8] sm:$0xff] }
  0xd9   : > { %2097 = vmatprep.subr.bf16.mxu1 %v3266_v41  ;;  %2007 = vmatmul.mubr.bf16.vlgmr.msra.gmra.mxu0 %v3763_v19  ;;  %v3081_v41 = vcombine.low %v248_v29, %v252_v30  ;;  %v3330_v44 = vcombine.high %v496_v39, %v500_v40  ;;  %v3329_v51 = vcombine.low %v496_v39, %v500_v40 }
  0xda   : > { %2057 = vmatpush1.bf16.msra.mxu0 %v3137_v46  ;;  %2088 = vmatprep.mubr.bf16.mxu0 %v3717_v4  ;;  %v404_v4 = vld [vmem:[%s3667_s28 + $0x4f8] sm:$0xff] }
  0xdb   : > { %2048 = vmatmul.mubr.bf16.vlgmr.msra.gmra.mxu1 %v3771_v27  ;;  %2058 = vmatprep.subr.bf16.mxu0 %v3130_v49  ;;  %v3234_v12 = vcombine.high %v400_v8, %v404_v4  ;;  %v3233_v18 = vcombine.low %v400_v8, %v404_v4  ;;  %v364_v46 = vld [vmem:[%s3667_s28 + $0x3b8] sm:$0xff] }
  0xdc   : > { %2098 = vmatpush1.bf16.msra.mxu1 %v3265_v47  ;;  %2129 = vmatprep.mubr.bf16.mxu1 %v3724_v10  ;;  %v3241_v10 = vcombine.low %v408_v63, %v412_v0  ;;  %v488_v47 = vld [vmem:[%s3667_s28 + $0x798] sm:$0xff]  ;;  %v3194_v52 = vcombine.high %v360_v45, %v364_v46 }
  0xdd   : > { %2099 = vmatprep.subr.bf16.mxu1 %v3258_v50  ;;  %v492_v49 = vld [vmem:[%s3667_s28 + $0x7b8] sm:$0xff]  ;;  %v3201_v50 = vcombine.low %v368_v37, %v372_v38 }
  0xde   : > { %2059 = vmatpush1.bf16.msra.mxu0 %v3129_v55  ;;  %v3322_v53 = vcombine.high %v488_v47, %v492_v49  ;;  %v356_v55 = vld [vmem:[%s3667_s28 + $0x378] sm:$0xff]  ;;  %v3321_v61 = vcombine.low %v488_v47, %v492_v49 }
  0xdf   : > { %2060 = vmatprep.subr.bf16.mxu0 %v3122_v58  ;;  %v484_v58 = vld [vmem:[%s3667_s28 + $0x778] sm:$0xff]  ;;  %v3186_v62 = vcombine.high %v352_v54, %v356_v55 }
  0xe0   : > { %2100 = vmatpush1.bf16.msra.mxu1 %v3257_v56  ;;  %v480_v56 = vld [vmem:[%s3667_s28 + $0x758] sm:$0xff] }
  0xe1   : > { %2101 = vmatprep.subr.bf16.mxu1 %v3250_v59  ;;  %v3193_v59 = vcombine.low %v360_v45, %v364_v46  ;;  %v3314_v63 = vcombine.high %v480_v56, %v484_v58  ;;  %v344_v0 = vld [vmem:[%s3667_s28 + $0x318] sm:$0xff]  ;;  %v3313_v6 = vcombine.low %v480_v56, %v484_v58 }
  0xe2   : > { %2061 = vmatpush1.bf16.msra.mxu0 %v3121_v1  ;;  %v348_v1 = vld [vmem:[%s3667_s28 + $0x338] sm:$0xff] }
  0xe3   : > { %2062 = vmatprep.subr.bf16.mxu0 %v3114_v3  ;;  %v476_v3 = vld [vmem:[%s3667_s28 + $0x738] sm:$0xff]  ;;  %v3178_v7 = vcombine.high %v344_v0, %v348_v1 }
  0xe4   : > { %2102 = vmatpush1.bf16.msra.mxu1 %v3249_v2  ;;  %v472_v2 = vld [vmem:[%s3667_s28 + $0x718] sm:$0xff] }
  0xe5   : > { %2103 = vmatprep.subr.bf16.mxu1 %v3242_v5  ;;  %v3185_v5 = vcombine.low %v352_v54, %v356_v55  ;;  %v3306_v8 = vcombine.high %v472_v2, %v476_v3  ;;  %v336_v4 = vld [vmem:[%s3667_s28 + $0x2d8] sm:$0xff]  ;;  %v3305_v13 = vcombine.low %v472_v2, %v476_v3  ;;  %v3614_v54 = vmov 1983009808  }
  0xe6   : > { %2063 = vmatpush1.bf16.msra.mxu0 %v3113_v9  ;;  %v340_v9 = vld [vmem:[%s3667_s28 + $0x2f8] sm:$0xff]  ;;  %v2149_v55 = vunpack.c.l.s4 %v3614_v54 }
  0xe7   : > { %2064 = vmatprep.subr.bf16.mxu0 %v3106_v11  ;;  %v468_v11 = vld [vmem:[%s3667_s28 + $0x6f8] sm:$0xff]  ;;  %v3170_v14 = vcombine.high %v336_v4, %v340_v9 }
  0xe8   : > { %2104 = vmatpush1.bf16.msra.mxu1 %v3241_v10  ;;  %v464_v10 = vld [vmem:[%s3667_s28 + $0x6d8] sm:$0xff]  ;;  %v2150_v56 = vunpack.c.0.s8 %v2149_v55 }
  0xe9   : > { %2105 = vmatprep.subr.bf16.mxu1 %v3234_v12  ;;  %v3177_v12 = vcombine.low %v344_v0, %v348_v1  ;;  %v3298_v15 = vcombine.high %v464_v10, %v468_v11  ;;  %v3297_v22 = vcombine.low %v464_v10, %v468_v11 }
  0xea   : > { %2065 = vmatpush1.bf16.msra.mxu0 %v3105_v17  ;;  %v332_v17 = vld [vmem:[%s3667_s28 + $0x2b8] sm:$0xff] }
  0xeb   : > { %2066 = vmatprep.subr.bf16.mxu0 %v3098_v20  ;;  %v460_v20 = vld [vmem:[%s3667_s28 + $0x6b8] sm:$0xff]  ;;  %v3162_v23 = vcombine.high %v328_v16, %v332_v17 }
  0xec   : > { %2106 = vmatpush1.bf16.msra.mxu1 %v3233_v18  ;;  %v456_v18 = vld [vmem:[%s3667_s28 + $0x698] sm:$0xff] }
  0xed   : > { %2107 = vmatprep.subr.bf16.mxu1 %v3226_v21  ;;  %v3169_v21 = vcombine.low %v336_v4, %v340_v9  ;;  %v3290_v24 = vcombine.high %v456_v18, %v460_v20  ;;  %v3289_v29 = vcombine.low %v456_v18, %v460_v20 }
  0xee   : > { %2067 = vmatpush1.bf16.msra.mxu0 %v3097_v26  ;;  %v324_v26 = vld [vmem:[%s3667_s28 + $0x278] sm:$0xff] }
  0xef   : > { %2068 = vmatprep.subr.bf16.mxu0 %v3090_v60  ;;  %v452_v60 = vld [vmem:[%s3667_s28 + $0x678] sm:$0xff]  ;;  %v3154_v30 = vcombine.high %v320_v25, %v324_v26 }
  0xf0   : > { %2108 = vmatpush1.bf16.msra.mxu1 %v3225_v57  ;;  %v448_v57 = vld [vmem:[%s3667_s28 + $0x658] sm:$0xff] }
  0xf1   : > { %2109 = vmatprep.subr.bf16.mxu1 %v3218_v28  ;;  %v3161_v28 = vcombine.low %v328_v16, %v332_v17  ;;  %v3282_v31 = vcombine.high %v448_v57, %v452_v60  ;;  %v3281_v37 = vcombine.low %v448_v57, %v452_v60 }
  0xf2   : > { %2069 = vmatpush1.bf16.msra.mxu0 %v3089_v33  ;;  %v316_v33 = vld [vmem:[%s3667_s28 + $0x238] sm:$0xff] }
  0xf3   : > { %2070 = vmatprep.subr.bf16.mxu0 %v3082_v35  ;;  %v444_v35 = vld [vmem:[%s3667_s28 + $0x638] sm:$0xff]  ;;  %v3146_v38 = vcombine.high %v312_v32, %v316_v33  ;;  %v3145_v40 = vcombine.low %v312_v32, %v316_v33 }
  0xf4   : > { %2110 = vmatpush1.bf16.msra.mxu1 %v3217_v34  ;;  %v440_v34 = vld [vmem:[%s3667_s28 + $0x618] sm:$0xff] }
  0xf5   : > { %2111 = vmatprep.subr.bf16.mxu1 %v3210_v36  ;;  %v3153_v36 = vcombine.low %v320_v25, %v324_v26  ;;  %v3274_v39 = vcombine.high %v440_v34, %v444_v35 }
  0xf6   : > { %2071 = vmatpush1.bf16.msra.mxu0 %v3081_v41  ;;  %v3273_v41 = vcombine.low %v440_v34, %v444_v35  ;;  %v243_v34 = vld [vmem:[#allocation2 + $0x8] sm:$0xff] }
  0xf7   : > { %2072 = vmatprep.subr.bf16.mxu0 %v3202_v43 }
  0xf8   : > { %2112 = vmatpush1.bf16.msra.mxu1 %v3209_v42 }
  0xf9   : > { %2113 = vmatprep.subr.bf16.mxu1 %v3330_v44 }
  0xfa   : > { %2073 = vmatpush2.bf16.msra.mxu0 %v3201_v50 }
  0xfb   : > { %2074 = vmatprep.subr.bf16.mxu0 %v3194_v52 }
  0xfc   : > { %2114 = vmatpush2.bf16.msra.mxu1 %v3329_v51 }
  0xfd   : > { %2115 = vmatprep.subr.bf16.mxu1 %v3322_v53 }
  0xfe   : > { %2075 = vmatpush2.bf16.msra.mxu0 %v3193_v59 }
  0xff   : > { %2076 = vmatprep.subr.bf16.mxu0 %v3186_v62 }
 0x100   : > { %2116 = vmatpush2.bf16.msra.mxu1 %v3321_v61 }
 0x101   : > { %2117 = vmatprep.subr.bf16.mxu1 %v3314_v63  ;;  %v3972_v63 = vsub.s32 %v2150_v56, %v3694_v48 }
 0x102   : > { %2077 = vmatpush2.bf16.msra.mxu0 %v3185_v5 }
 0x103   : > { %2078 = vmatprep.subr.bf16.mxu0 %v3178_v7 }
 0x104   : > { %2118 = vmatpush2.bf16.msra.mxu1 %v3313_v6 }
 0x105   : > { %2119 = vmatprep.subr.bf16.mxu1 %v3306_v8  ;;  %v242_v8 = vld [vmem:[#allocation2] sm:$0xff] }
 0x106   : > { %2079 = vmatpush2.bf16.msra.mxu0 %v3177_v12 }
 0x107   : > { %2080 = vmatprep.subr.bf16.mxu0 %v3170_v14 }
 0x108   : > { %2120 = vmatpush2.bf16.msra.mxu1 %v3305_v13 }
 0x109   : > { %2121 = vmatprep.subr.bf16.mxu1 %v3298_v15 }
 0x10a   : > { %2081 = vmatpush2.bf16.msra.mxu0 %v3169_v21 }
 0x10b   : > { %2082 = vmatprep.subr.bf16.mxu0 %v3162_v23 }
 0x10c   : > { %2122 = vmatpush2.bf16.msra.mxu1 %v3297_v22 }
 0x10d   : > { %2123 = vmatprep.subr.bf16.mxu1 %v3290_v24 }
 0x10e   : > { %2083 = vmatpush2.bf16.msra.mxu0 %v3161_v28 }
 0x10f   : > { %2084 = vmatprep.subr.bf16.mxu0 %v3154_v30 }
 0x110   : > { %2124 = vmatpush2.bf16.msra.mxu1 %v3289_v29 }
 0x111   : > { %2125 = vmatprep.subr.bf16.mxu1 %v3282_v31 }
 0x112   : > { %2085 = vmatpush2.bf16.msra.mxu0 %v3153_v36 }
 0x113   : > { %2086 = vmatprep.subr.bf16.mxu0 %v3146_v38 }
 0x114   : > { %2126 = vmatpush2.bf16.msra.mxu1 %v3281_v37 }
 0x115   : > { %2127 = vmatprep.subr.bf16.mxu1 %v3274_v39 }
 0x116   : > { %2087 = vmatpush2.bf16.msra.mxu0 %v3145_v40 }
 0x118   : > { %2128 = vmatpush2.bf16.msra.mxu1 %v3273_v41 }
 0x119   : > { %v1844_v42 = vpop.f32.mrf.mxu0  ;;  %2089 = vmatmul.mubr.bf16.vlgmr.msra.gmra.mxu0 %v3763_v19 }
 0x11b   : > { %v1885_v43 = vpop.f32.mrf.mxu1  ;;  %2130 = vmatmul.mubr.bf16.vlgmr.msra.gmra.mxu1 %v3771_v27  ;;  %v1846_v45 = vpop.f32.mrf.mxu0 }
 0x11c   : > { %v1886_v44 = vadd.f32 %v1885_v43, %v1844_v42 }
 0x11d   : > { %v1887_v46 = vpop.f32.mrf.mxu1  ;;  %v1848_v49 = vpop.f32.mrf.mxu0 }
 0x11e   : > { %v1888_v47 = vadd.f32 %v1887_v46, %v1846_v45 }
 0x11f   : > { %v1889_v50 = vpop.f32.mrf.mxu1  ;;  %v1849_v52 = vpop.f32.mrf.mxu0 }
 0x120   : > { %v2146_v51 = vcombine.low %v1886_v44, %v1888_v47 }
 0x121   : > { %v1890_v53 = vpop.f32.mrf.mxu1 }
 0x122   : > { %v2154_v6 = vrot.slane %v2146_v51, %v3972_v63 }
 0x159   : > { %v1926_v58 = vpop.f32.mrf.mxu0 }
 0x15b   : > { %v1967_v59 = vpop.f32.mrf.mxu1  ;;  %v1928_v62 = vpop.f32.mrf.mxu0 }
 0x15c   : > { %v1968_v61 = vadd.f32 %v1967_v59, %v1926_v58 }
 0x15d   : > { %v1969_v19 = vpop.f32.mrf.mxu1  ;;  %v1930_v0 = vpop.f32.mrf.mxu0 }
 0x15e   : > { %v1970_v27 = vadd.f32 %v1969_v19, %v1928_v62 }
 0x15f   : > { %v1971_v1 = vpop.f32.mrf.mxu1  ;;  %v1931_v3 = vpop.f32.mrf.mxu0 }
 0x160   : > { %v2147_v2 = vcombine.low %v1968_v61, %v1970_v27 }
 0x161   : > { %v1972_v5 = vpop.f32.mrf.mxu1 }
 0x162   : > { %v2161_v7 = vrot.slane %v2147_v2, %v3972_v63 }
 0x164   : > { %v2162_v4 = vcombine.low %v2154_v6, %v2161_v7 }
 0x166   : > { %v2182_v9 = vadd.f32 %v2162_v4, %v242_v8 }
 0x168   : > { %2184 = vst [vmem:[#allocation2] sm:$0xff] %v2182_v9 }
 0x199   : > { %v2008_v10 = vpop.f32.mrf.mxu0 }
 0x19b   : > { %v2049_v11 = vpop.f32.mrf.mxu1  ;;  %v2010_v13 = vpop.f32.mrf.mxu0 }
 0x19c   : > { %v2050_v12 = vadd.f32 %v2049_v11, %v2008_v10 }
 0x19d   : > { %v2051_v14 = vpop.f32.mrf.mxu1  ;;  %v2012_v16 = vpop.f32.mrf.mxu0 }
 0x19e   : > { %v2052_v15 = vadd.f32 %v2051_v14, %v2010_v13 }
 0x19f   : > { %v2053_v17 = vpop.f32.mrf.mxu1  ;;  %v2013_v20 = vpop.f32.mrf.mxu0 }
 0x1a0   : > { %v2163_v18 = vcombine.low %v2050_v12, %v2052_v15 }
 0x1a1   : > { %v2054_v21 = vpop.f32.mrf.mxu1 }
 0x1a2   : > { %v2171_v32 = vrot.slane %v2163_v18, %v3972_v63 }
 0x1d9   : > { %v2090_v22 = vpop.f32.mrf.mxu0 }
 0x1db   : > { %v2131_v23 = vpop.f32.mrf.mxu1  ;;  %v2092_v24 = vpop.f32.mrf.mxu0 }
 0x1dc   : > { %v2132_v26 = vadd.f32 %v2131_v23, %v2090_v22 }
 0x1dd   : > { %v2133_v25 = vpop.f32.mrf.mxu1  ;;  %v2094_v60 = vpop.f32.mrf.mxu0 }
 0x1de   : > { %v2134_v57 = vadd.f32 %v2133_v25, %v2092_v24 }
 0x1df   : > { %v2135_v28 = vpop.f32.mrf.mxu1  ;;  %v2095_v30 = vpop.f32.mrf.mxu0 }
 0x1e0   : > { %v2164_v29 = vcombine.low %v2132_v26, %v2134_v57 }
 0x1e1   : > { %v2136_v31 = vpop.f32.mrf.mxu1 }
 0x1e2   : > { %v2178_v33 = vrot.slane %v2164_v29, %v3972_v63 }
 0x1e4   : > { %v2179_v35 = vcombine.low %v2171_v32, %v2178_v33  ;;  %2189 = sbr.rel (%p3331_p6) target bundleno = 1069 (0x42d), region = 48 }
 0x1e6   : > { %v2183_v36 = vadd.f32 %v2179_v35, %v243_v34 }
 0x1e8   : > { %2185 = vst [vmem:[#allocation2 + $0x8] sm:$0xff] %v2183_v36 }
 0x1e9   : > { %v3508_v37 = vld [vmem:[%s4214_s3 + $0x78] sm:$0xff]   ;;  %v3512_v41 = vld [vmem:[%s4214_s3 + $0x70] sm:$0xff]   ;;  %v3516_v45 = vld [vmem:[%s4214_s3 + $0x68] sm:$0xff]   ;;  %v2196_v2 = vsub.s32 0, %v3694_v48  ;;  %v2200_v5 = vsub.s32 1, %v3694_v48  ;;  %v2204_v7 = vsub.s32 2, %v3694_v48 }
 0x1ea   : > { %v3509_v38 = vld [vmem:[%s4214_s3 + $0xf8] sm:$0xff]   ;;  %3402 = vmatprep.subr.bf16.mxu0 %v3508_v37  ;;  %v3513_v42 = vld [vmem:[%s4214_s3 + $0xf0] sm:$0xff]   ;;  %v3517_v46 = vld [vmem:[%s4214_s3 + $0xe8] sm:$0xff]   ;;  %v2208_v4 = vsub.s32 3, %v3694_v48  ;;  %v2212_v57 = vsub.s32 4, %v3694_v48  ;;  %v2216_v60 = vsub.s32 5, %v3694_v48 }
 0x1eb   : > { %v3510_v39 = vld [vmem:[%s4214_s3 + $0x38] sm:$0xff]   ;;  %3424 = vmatprep.subr.bf16.mxu1 %v3509_v38  ;;  %v3514_v43 = vld [vmem:[%s4214_s3 + $0x30] sm:$0xff]   ;;  %v3518_v47 = vld [vmem:[%s4214_s3 + $0x28] sm:$0xff]   ;;  %v2220_v30 = vsub.s32 6, %v3694_v48  ;;  %v2224_v31 = vsub.s32 7, %v3694_v48  ;;  %vm2997_vm0 = vcmask 9216  }
 0x1ec   : > { %v3511_v40 = vld [vmem:[%s4214_s3 + $0xb8] sm:$0xff]   ;;  %3403 = vmatpush3.bf16.msra.mxu0 %v3510_v39  ;;  %v3515_v44 = vld [vmem:[%s4214_s3 + $0xb0] sm:$0xff]   ;;  %v3519_v49 = vld [vmem:[%s4214_s3 + $0xa8] sm:$0xff]  }
 0x1ed   : > { %3425 = vmatpush3.bf16.msra.mxu1 %v3511_v40  ;;  %3404 = vmatprep.subr.bf16.mxu0 %v3512_v41  ;;  %v3520_v50 = vld [vmem:[%s4214_s3 + $0x60] sm:$0xff]   ;;  %v3524_v54 = vld [vmem:[%s4214_s3 + $0x58] sm:$0xff]   ;;  %v3528_v59 = vld [vmem:[%s4214_s3 + $0x50] sm:$0xff]  }
 0x1ee   : > { %3426 = vmatprep.subr.bf16.mxu1 %v3513_v42  ;;  %v3521_v51 = vld [vmem:[%s4214_s3 + $0xe0] sm:$0xff]   ;;  %v3525_v55 = vld [vmem:[%s4214_s3 + $0xd8] sm:$0xff]   ;;  %v3529_v61 = vld [vmem:[%s4214_s3 + $0xd0] sm:$0xff]  }
 0x1ef   : > { %v3522_v52 = vld [vmem:[%s4214_s3 + $0x20] sm:$0xff]   ;;  %v3526_v56 = vld [vmem:[%s4214_s3 + $0x18] sm:$0xff]   ;;  %v3530_v62 = vld [vmem:[%s4214_s3 + $0x10] sm:$0xff]  }
 0x1f0   : > { %3405 = vmatpush3.bf16.msra.mxu0 %v3514_v43  ;;  %v3523_v53 = vld [vmem:[%s4214_s3 + $0xa0] sm:$0xff]   ;;  %v3527_v58 = vld [vmem:[%s4214_s3 + $0x98] sm:$0xff]   ;;  %v3531_v19 = vld [vmem:[%s4214_s3 + $0x90] sm:$0xff]  }
 0x1f1   : > { %3427 = vmatpush3.bf16.msra.mxu1 %v3515_v44  ;;  %3406 = vmatprep.subr.bf16.mxu0 %v3516_v45  ;;  %v3532_v27 = vld [vmem:[%s4214_s3 + $0x48] sm:$0xff]   ;;  %v3536_v6 = vld [vmem:[%s4214_s3 + $0x40] sm:$0xff]   ;;  %v3540_v16 = vld [vmem:[%s4214_s3 + $0x178] sm:$0xff]  }
 0x1f2   : > { %3428 = vmatprep.subr.bf16.mxu1 %v3517_v46  ;;  %v3533_v0 = vld [vmem:[%s4214_s3 + $0xc8] sm:$0xff]   ;;  %v3537_v8 = vld [vmem:[%s4214_s3 + $0xc0] sm:$0xff]   ;;  %v3541_v17 = vld [vmem:[%s4214_s3 + $0x1f8] sm:$0xff]  }
 0x1f3   : > { %v3534_v1 = vld [vmem:[%s4214_s3 + $0x8] sm:$0xff]   ;;  %v3538_v9 = vld [vmem:[%s4214_s3] sm:$0xff]   ;;  %v3542_v39 = vld [vmem:[%s4214_s3 + $0x138] sm:$0xff]  }
 0x1f4   : > { %3407 = vmatpush3.bf16.msra.mxu0 %v3518_v47  ;;  %v3535_v3 = vld [vmem:[%s4214_s3 + $0x88] sm:$0xff]   ;;  %v3539_v10 = vld [vmem:[%s4214_s3 + $0x80] sm:$0xff]   ;;  %v3544_v43 = vld [vmem:[%s4214_s3 + $0x170] sm:$0xff]  }
 0x1f5   : > { %3429 = vmatpush3.bf16.msra.mxu1 %v3519_v49  ;;  %3408 = vmatprep.subr.bf16.mxu0 %v3520_v50  ;;  %v2192_v11 = vld [vmem:[%s4213_s2] sm:$0xff]  ;;  %v3543_v44 = vld [vmem:[%s4214_s3 + $0x1b8] sm:$0xff]   ;;  %v3545_v45 = vld [vmem:[%s4214_s3 + $0x1f0] sm:$0xff]  }
 0x1f6   : > { %3430 = vmatprep.subr.bf16.mxu1 %v3521_v51  ;;  %v2197_v12 = vrot.slane %v2192_v11, %v2196_v2  ;;  %v2201_v13 = vrot.slane %v2192_v11, %v2200_v5  ;;  %v2205_v14 = vrot.slane %v2192_v11, %v2204_v7  ;;  %v2209_v15 = vrot.slane %v2192_v11, %v2208_v4  ;;  %v2190_v23 = vld [vmem:[#allocation2] sm:$0xff]  ;;  %v3546_v46 = vld [vmem:[%s4214_s3 + $0x130] sm:$0xff]   ;;  %v3548_v50 = vld [vmem:[%s4214_s3 + $0x168] sm:$0xff]  }
 0x1f7   : > { %v2213_v35 = vrot.slane %v2192_v11, %v2212_v57  ;;  %v2217_v36 = vrot.slane %v2192_v11, %v2216_v60  ;;  %v2221_v40 = vrot.slane %v2192_v11, %v2220_v30  ;;  %v2225_v41 = vrot.slane %v2192_v11, %v2224_v31  ;;  %v3547_v51 = vld [vmem:[%s4214_s3 + $0x1b0] sm:$0xff]   ;;  %v3558_v2 = vld [vmem:[%s4214_s3 + $0x118] sm:$0xff]   ;;  %v3564_v11 = vld [vmem:[%s4214_s3 + $0x148] sm:$0xff]  }
 0x1f8   : > { %3409 = vmatpush3.bf16.msra.mxu0 %v3522_v52  ;;  %v2226_v18 = vcombine.low %v2197_v12, %v2201_v13  ;;  %v2227_v20 = vcombine.low %v2205_v14, %v2209_v15  ;;  %v3549_v52 = vld [vmem:[%s4214_s3 + $0x1e8] sm:$0xff]   ;;  %v3560_v5 = vld [vmem:[%s4214_s3 + $0x150] sm:$0xff]  }
 0x1f9   : > { %3431 = vmatpush3.bf16.msra.mxu1 %v3523_v53  ;;  %3410 = vmatprep.subr.bf16.mxu0 %v3524_v54  ;;  %v2243_v47 = vcombine.low %v2213_v35, %v2217_v36  ;;  %v2244_v49 = vcombine.low %v2221_v40, %v2225_v41  ;;  %v3550_v53 = vld [vmem:[%s4214_s3 + $0x128] sm:$0xff]   ;;  %v3562_v4 = vld [vmem:[%s4214_s3 + $0x110] sm:$0xff]   ;;  %v3332_v35 = vld [vmem:[%s4215_s4] ss:$0 sm:$0xff] }
 0x1fa   : > { %3432 = vmatprep.subr.bf16.mxu1 %v3525_v55  ;;  %v2234_v21 = vrot.slane %v2226_v18, %v3972_v63  ;;  %v2241_v22 = vrot.slane %v2227_v20, %v3972_v63  ;;  %v3563_v12 = vld [vmem:[%s4214_s3 + $0x190] sm:$0xff]   ;;  %v3565_v15 = vld [vmem:[%s4214_s3 + $0x1c8] sm:$0xff]   ;;  %v3568_v20 = vld [vmem:[%s4214_s3 + $0x140] sm:$0xff]  }
 0x1fb   : > { %v2251_v54 = vrot.slane %v2243_v47, %v3972_v63  ;;  %v2258_v55 = vrot.slane %v2244_v49, %v3972_v63 }
 0x1fc   : > { %3411 = vmatpush3.bf16.msra.mxu0 %v3526_v56  ;;  %v2242_v24 = vcombine.low %v2234_v21, %v2241_v22  ;;  %v3552_v56 = vld [vmem:[%s4214_s3 + $0x160] sm:$0xff]  }
 0x1fd   : > { %3433 = vmatpush3.bf16.msra.mxu1 %v3527_v58  ;;  %3412 = vmatprep.subr.bf16.mxu0 %v3528_v59  ;;  %v3551_v58 = vld [vmem:[%s4214_s3 + $0x1a8] sm:$0xff]   ;;  %v3553_v59 = vld [vmem:[%s4214_s3 + $0x1e0] sm:$0xff]  }
 0x1fe   : > { %3434 = vmatprep.subr.bf16.mxu1 %v3529_v61  ;;  %v2262_v25 = vadd.f32 %v2242_v24, %v2190_v23  ;;  %v3554_v61 = vld [vmem:[%s4214_s3 + $0x120] sm:$0xff]  }
 0x1ff   : > { %v3569_v22 = vld [vmem:[%s4214_s3 + $0x1c0] sm:$0xff]  }
 0x200   : > { %3413 = vmatpush3.bf16.msra.mxu0 %v3530_v62  ;;  %v2264_v26 = vmax.f32 %v2262_v25, 0.0  ;;  %v2259_v62 = vcombine.low %v2251_v54, %v2258_v55  ;;  %v3570_v23 = vld [vmem:[%s4214_s3 + $0x100] sm:$0xff]  }
 0x201   : > { %3435 = vmatpush3.bf16.msra.mxu1 %v3531_v19  ;;  %3414 = vmatprep.subr.bf16.mxu0 %v3532_v27  ;;  %v3556_v19 = vld [vmem:[%s4214_s3 + $0x158] sm:$0xff]   ;;  %v3555_v27 = vld [vmem:[%s4214_s3 + $0x1a0] sm:$0xff]  }
 0x202   : > { %3436 = vmatprep.subr.bf16.mxu1 %v3533_v0  ;;  %v2275_v28 = vrot.slane %v2264_v26, %v3972_v63  ;;  %v2268_v29 = vcombine.high %v2264_v26, %v2264_v26  ;;  %v3557_v0 = vld [vmem:[%s4214_s3 + $0x1d8] sm:$0xff]   ;;  %v3571_v24 = vld [vmem:[%s4214_s3 + $0x180] sm:$0xff]  }
 0x204   : > { %3415 = vmatpush3.bf16.msra.mxu0 %v3534_v1  ;;  %v2283_v32 = vcombine.high %v2275_v28, %v2275_v28  ;;  %v2282_v33 = vrot.slane %v2268_v29, %v3972_v63  ;;  %v2310_v34 = vpack.c.bf16 %v2275_v28, %v2275_v28  ;;  %v2191_v1 = vld [vmem:[#allocation2 + $0x8] sm:$0xff] }
 0x205   : > { %3437 = vmatpush3.bf16.msra.mxu1 %v3535_v3  ;;  %3416 = vmatprep.subr.bf16.mxu0 %v3536_v6  ;;  %v2263_v3 = vadd.f32 %v2259_v62, %v2191_v1  ;;  %v3559_v6 = vld [vmem:[%s4214_s3 + $0x198] sm:$0xff]  }
 0x206   : > { %3438 = vmatprep.subr.bf16.mxu1 %v3537_v8  ;;  %v2311_v37 = vpack.c.bf16 %v2283_v32, %v2283_v32  ;;  %v2284_v38 = vcombine.high %v2282_v33, %v2282_v33  ;;  %v2312_v42 = vpack.c.bf16 %v2282_v33, %v2282_v33  ;;  %v3561_v8 = vld [vmem:[%s4214_s3 + $0x1d0] sm:$0xff]  }
 0x207   : > { %v2265_v7 = vmax.f32 %v2263_v3, 0.0 }
 0x208   : > { %3417 = vmatpush3.bf16.msra.mxu0 %v3538_v9  ;;  %2869 = vmatprep.mubr.bf16.mxu0 %v2311_v37  ;;  %v2313_v48 = vpack.c.bf16 %v2284_v38, %v2284_v38 }
 0x209   : > { %3439 = vmatpush3.bf16.msra.mxu1 %v3539_v10  ;;  %3446 = vmatprep.subr.bf16.mxu0 %v3540_v16  ;;  %v2292_v9 = vrot.slane %v2265_v7, %v3972_v63  ;;  %v2285_v10 = vcombine.high %v2265_v7, %v2265_v7  ;;  %v3566_v16 = vld [vmem:[%s4214_s3 + $0x108] sm:$0xff]  }
 0x20a   : > { %3468 = vmatprep.subr.bf16.mxu1 %v3541_v17  ;;  %2909 = vmatprep.mubr.bf16.mxu1 %v2313_v48 }
 0x20b   : > { %2870 = vmatmul.mubr.bf16.vlgmr.msra.gmra.mxu0 %v2310_v34  ;;  %v2300_v13 = vcombine.high %v2292_v9, %v2292_v9  ;;  %v2299_v14 = vrot.slane %v2285_v10, %v3972_v63  ;;  %v3567_v63 = vld [vmem:[%s4214_s3 + $0x188] sm:$0xff]   ;;  %v2314_v25 = vpack.c.bf16 %v2292_v9, %v2292_v9 }
 0x20c   : > { %3447 = vmatpush3.bf16.msra.mxu0 %v3542_v39  ;;  %2910 = vmatmul.mubr.bf16.vlgmr.msra.gmra.mxu1 %v2312_v42 }
 0x20d   : > { %3448 = vmatprep.subr.bf16.mxu0 %v3544_v43  ;;  %3469 = vmatpush3.bf16.msra.mxu1 %v3543_v44  ;;  %v2315_v17 = vpack.c.bf16 %v2300_v13, %v2300_v13  ;;  %v2301_v18 = vcombine.high %v2299_v14, %v2299_v14  ;;  %v2316_v26 = vpack.c.bf16 %v2299_v14, %v2299_v14 }
 0x20e   : > { %3470 = vmatprep.subr.bf16.mxu1 %v3545_v45 }
 0x20f   : > { %2949 = vmatprep.mubr.bf16.mxu0 %v2315_v17  ;;  %v2317_v21 = vpack.c.bf16 %v2301_v18, %v2301_v18 }
 0x210   : > { %3449 = vmatpush3.bf16.msra.mxu0 %v3546_v46 }
 0x211   : > { %3450 = vmatprep.subr.bf16.mxu0 %v3548_v50  ;;  %3471 = vmatpush3.bf16.msra.mxu1 %v3547_v51 }
 0x212   : > { %3472 = vmatprep.subr.bf16.mxu1 %v3549_v52  ;;  %2989 = vmatprep.mubr.bf16.mxu1 %v2317_v21 }
 0x214   : > { %3451 = vmatpush3.bf16.msra.mxu0 %v3550_v53 }
 0x215   : > { %3452 = vmatprep.subr.bf16.mxu0 %v3552_v56  ;;  %3473 = vmatpush3.bf16.msra.mxu1 %v3551_v58 }
 0x216   : > { %3474 = vmatprep.subr.bf16.mxu1 %v3553_v59 }
 0x218   : > { %3453 = vmatpush3.bf16.msra.mxu0 %v3554_v61 }
 0x219   : > { %3454 = vmatprep.subr.bf16.mxu0 %v3556_v19  ;;  %3475 = vmatpush3.bf16.msra.mxu1 %v3555_v27 }
 0x21a   : > { %3476 = vmatprep.subr.bf16.mxu1 %v3557_v0 }
 0x21c   : > { %3455 = vmatpush3.bf16.msra.mxu0 %v3558_v2 }
 0x21d   : > { %3456 = vmatprep.subr.bf16.mxu0 %v3560_v5  ;;  %3477 = vmatpush3.bf16.msra.mxu1 %v3559_v6 }
 0x21e   : > { %3478 = vmatprep.subr.bf16.mxu1 %v3561_v8 }
 0x220   : > { %3457 = vmatpush3.bf16.msra.mxu0 %v3562_v4 }
 0x221   : > { %3458 = vmatprep.subr.bf16.mxu0 %v3564_v11  ;;  %3479 = vmatpush3.bf16.msra.mxu1 %v3563_v12 }
 0x222   : > { %3480 = vmatprep.subr.bf16.mxu1 %v3565_v15 }
 0x224   : > { %3459 = vmatpush3.bf16.msra.mxu0 %v3566_v16 }
 0x225   : > { %3460 = vmatprep.subr.bf16.mxu0 %v3568_v20  ;;  %3481 = vmatpush3.bf16.msra.mxu1 %v3567_v63 }
 0x226   : > { %3482 = vmatprep.subr.bf16.mxu1 %v3569_v22 }
 0x228   : > { %3461 = vmatpush3.bf16.msra.mxu0 %v3570_v23 }
 0x229   : > { %3483 = vmatpush3.bf16.msra.mxu1 %v3571_v24 }
 0x22b   : > { %2950 = vmatmul.mubr.bf16.vlgmr.msra.gmra.mxu0 %v2314_v25 }
 0x22c   : > { %2990 = vmatmul.mubr.bf16.vlgmr.msra.gmra.mxu1 %v2316_v26 }
 0x2cb   : > { %v3418_v57 = vpop.f32.mrf.mxu0 }
 0x2cc   : > { %v3440_v60 = vpop.f32.mrf.mxu1 }
 0x2cd   : > { %v3419_v28 = vpop.f32.mrf.mxu0 }
 0x2ce   : > { %v3441_v29 = vpop.f32.mrf.mxu1  ;;  %v3420_v34 = vadd.f32 %v3419_v28, %v3418_v57 }
 0x2cf   : > { %v3421_v30 = vpop.f32.mrf.mxu0  ;;  %v3442_v37 = vadd.f32 %v3441_v29, %v3440_v60 }
 0x2d0   : > { %v3443_v31 = vpop.f32.mrf.mxu1  ;;  %v2872_v36 = vadd.f32 %v3420_v34, %v3332_v35 }
 0x2d1   : > { %v3422_v32 = vpop.f32.mrf.mxu0 }
 0x2d2   : > { %v3444_v33 = vpop.f32.mrf.mxu1  ;;  %v2912_v41 = vadd.f32 %v3442_v37, %v2872_v36 }
 0x2eb   : > { %v3462_v38 = vpop.f32.mrf.mxu0 }
 0x2ec   : > { %v3484_v39 = vpop.f32.mrf.mxu1 }
 0x2ed   : > { %v3463_v40 = vpop.f32.mrf.mxu0 }
 0x2ee   : > { %v3464_v42 = vadd.f32 %v3463_v40, %v3462_v38  ;;  %v3485_v43 = vpop.f32.mrf.mxu1 }
 0x2ef   : > { %v3465_v48 = vpop.f32.mrf.mxu0  ;;  %v3486_v45 = vadd.f32 %v3485_v43, %v3484_v39 }
 0x2f0   : > { %v2952_v44 = vadd.f32 %v3464_v42, %v2912_v41  ;;  %v3487_v46 = vpop.f32.mrf.mxu1 }
 0x2f1   : > { %v3466_v47 = vpop.f32.mrf.mxu0 }
 0x2f2   : > { %v2992_v49 = vadd.f32 %v3486_v45, %v2952_v44  ;;  %v3488_v50 = vpop.f32.mrf.mxu1 }
 0x2f4   : > { %v2998_v51 = vsel %vm2997_vm0, %v2992_v49, -inf }
 0x2f5   : > { %2999 = vmax.xlane.f32.xlu0 %v2998_v51 }
 0x37e   : > { %v3000_v52 = vpop.xlane.xlu0 %2999 }
 0x37f   : > { %v3001_v53 = vsub.f32 %v2992_v49, %v3000_v52 }
 0x381   : > { %v3002_v54 = vmul.f32 1.442695, %v3001_v53 }
 0x383   : > { %3572 = vpow2.f32 %v3002_v54 }
 0x390   : > { %v3573_v55 = vpop.eup %3572 }
 0x391   : > { %v3004_v56 = vsel %vm2997_vm0, %v3573_v55, 0.0 }
 0x392   : > { %3005 = vadd.xlane.f32.xlu0 %v3004_v56 }
 0x41b   : > { %v3006_v58 = vpop.xlane.xlu0 %3005 }
 0x41c   : > { %3574 = vrcp.f32 %v3006_v58 }
 0x429   : > { %v3575_v59 = vpop.eup %3574 }
 0x42a   : > { %v3008_v61 = vmul.f32 %v3575_v59, %v3573_v55 }
 0x42c   : > { %3009 = vst.msk [vmem:[#allocation3] sm:$0x3] %vm2997_vm0, %v3008_v61 }
 0x42d PF: > { %p3494_p7 = scmp.eq.s32.totalorder %s3652_s19, 1  ;;  %s3615_s25 = smov [#allocation3]  }
 0x42e   : > { %s3017_s26 = sshll.u32 %s3615_s25, 4  ;;  %s3018_s26 = int_to_ptr.vmem [resolvable:$true] %s3017_s26 }
 0x42f   : > { %s3576_s27 = scalar_lea.vmem %s3018_s26, 32  ;;  %p3583_p11 = scmp.lt.s32.totalorder %s3018_s26, %s3018_s26 }
 0x430   : > { %p3577_p8 = scmp.ne.s32.totalorder %s3018_s26, %s3576_s27  ;;  %p3584_p12 = scmp.lt.s32.totalorder %s3576_s27, %s3576_s27 }
 0x432   : > { %p3578_p9 = pnand %p3577_p8, %p3494_p7  ;;  %p3585_p13 = por %p3584_p12, %p3583_p11 }
 0x434   : > { %p3579_p10 = pneg %p3578_p9 }
 0x436   : > { %p3586_p0 = pnand %p3585_p13, %p3579_p10 }
 0x438   : > { %3589 = shalt.err (!%p3586_p0)
}
 0x439   : > { %3491 = dma.vmem_to_hbm [thread:$0]  (%p3494_p7), %s3018_s26, 32, %s4216_s5, [#allocation4]  }
 0x43a   : > { %3605 = dma.done.wait (%p3494_p7), [#allocation4], 32  }
 0x43b   : > { %3607 = vsyncadd (%p3494_p7), [#allocation4], 4294967264 }
 0x43c PF: > { %s16_s18 = sadd.s32 1, %s3610_s18  }
 0x43d   : > { %p13_p1 = scmp.ge.s32.totalorder %s16_s18, 4  }
 0x43f   :  { %15 = sbr.rel (!%p13_p1) target bundleno = 1 (0x1), region = 78 }
 0x444   :  { %3030 = vsyncpa [#allocation4], 1 }
 0x445   :  { %3032 = vsyncpa [#allocation4 + $0x1], 1 }

</bundles_post_ra>
